<compile_context>
chip_gen: v5e
topology: v5e:2x2
jax: 0.10.0
libtpu: 0.0.40
codegen_flags: <defaults>
</compile_context>

<pallas_src>
import functools

import jax
import jax.numpy as jnp
from jax import lax
from jax.experimental import pallas as pl
from jax.experimental.pallas import tpu as pltpu

# Deterministic "parameters" from Relative.__init__ (python scalars).
FACTUAL_LR = 0.30
COUNTERFACTUAL_LR = 0.15
CONTEXTUAL_LR = 0.20
TEMPERATURE = 0.50
NOVEL_VALUE = 0.0
DECAY_FACTOR = 0.95

LANE = 128
B_TILE_TARGET = 1024        # lane-axis tile target (multiple of 128)
T_CHUNK_TARGET = 32         # trials folded into one grid step
VMEM_STREAM_BUDGET = 8 << 20  # bytes; streamed blocks x2 double-buffer must fit


def _relative_rollout_kernel(q0_ref, ctx0_ref, r_ref, u_ref,
                             pe_ref, ctxpe_ref, act_ref, qf_ref, cf_ref,
                             *, num_actions, t_chunk):
    """One chunk of trials. Grid = (batch_tiles, T // t_chunk)."""
    tc = pl.program_id(1)
    A = num_actions
    inv_a = 1.0 / A
    inv_temp = 1.0 / TEMPERATURE
    lr_delta = FACTUAL_LR - COUNTERFACTUAL_LR

    # Init resident state from the initial values at the first chunk of this tile.
    @pl.when(tc == 0)
    def _():
        qf_ref[...] = q0_ref[...].astype(jnp.float32)
        cf_ref[...] = ctx0_ref[...].astype(jnp.float32)

    def trial(t, carry):
        q, ctx = carry                              # [A, Bt], [1, Bt]
        r = r_ref[t].astype(jnp.float32)            # [A, Bt]  rewards, this trial
        u = u_ref[t].astype(jnp.float32)            # [1, Bt]  uniform draw

        # --- get_reward tail: context_reward = average over stimuli ----------
        context_reward = jnp.sum(r, axis=0, keepdims=True) * inv_a   # [1, Bt]

        # --- compute_prediction_error -----------------------------------------
        pe = r - ctx - q                            # [A, Bt]
        ctx_pe = context_reward - ctx               # [1, Bt]

        # --- select_action: softmax(q/T) cumulative sampling -------------------
        # Max-subtracted exp (overflow-safe); no normalizing divide — compare
        # the unnormalized prefix sums against u * sum(exp).
        q_shift = q - jnp.max(q, axis=0, keepdims=True)
        tq = jnp.exp(q_shift * inv_temp)            # [A, Bt]
        total = jnp.sum(tq, axis=0, keepdims=True)  # [1, Bt]
        thresh = u * total                          # [1, Bt]

        # Prefix scan over the tiny static action axis.  The one-hot "chosen"
        # mask is built directly from the below-flags (no iota / eq / clamp):
        #   chosen_k     = below_{k-1} - below_k   (below_{-1} = 1)
        #   chosen_{A-1} = below_{A-2}
        #   action       = sum_{k<A-1} below_k     (clamped by construction)
        run = tq[0:1, :]
        below_prev = jnp.ones_like(thresh)
        action_f = jnp.zeros_like(thresh)
        chosen_rows = []
        for k in range(A - 1):
            below = (run < thresh).astype(jnp.float32)
            chosen_rows.append(below_prev - below)
            action_f = action_f + below
            below_prev = below
            if k + 1 < A - 1:
                run = run + tq[k + 1:k + 2, :]
        chosen_rows.append(below_prev)
        chosen = chosen_rows[0] if A == 1 else jnp.concatenate(chosen_rows, axis=0)

        # --- update_model -------------------------------------------------------
        # TODO(synk): RLToolbox.update_model is not provided; standard Relative
        # update used (factual LR on chosen, counterfactual LR on unchosen,
        # contextual LR on context value, decay applied to both).
        lr = COUNTERFACTUAL_LR + lr_delta * chosen
        q_new = DECAY_FACTOR * (q + lr * pe)
        ctx_new = DECAY_FACTOR * (ctx + CONTEXTUAL_LR * ctx_pe)

        # --- per-trial streamed outputs (cast only at the store) ----------------
        pe_ref[t] = pe.astype(pe_ref.dtype)
        ctxpe_ref[t] = ctx_pe.astype(ctxpe_ref.dtype)
        act_ref[t] = action_f.astype(act_ref.dtype)

        return q_new, ctx_new

    q_fin, ctx_fin = lax.fori_loop(0, t_chunk, trial,
                                   (qf_ref[...], cf_ref[...]), unroll=True)

    # Carry state (resident output blocks double as accumulators).
    qf_ref[...] = q_fin
    cf_ref[...] = ctx_fin


def _pick_b_tile(b_padded_128):
    """Lane tile: big enough to amortize step cost, >=2 tiles for v7x megacore."""
    bt = min(b_padded_128, B_TILE_TARGET)
    if b_padded_128 >= 2 * LANE:
        half = max(LANE, (b_padded_128 // 2) // LANE * LANE)
        bt = min(bt, half)
    return max(LANE, (bt // LANE) * LANE)


def _pick_t_chunk(T, A, b_tile):
    """Largest divisor of T <= T_CHUNK_TARGET that keeps streamed blocks in budget."""
    per_trial_bytes = (2 * A + 3) * b_tile * 4 * 2   # in+out streams, x2 double-buffer
    max_tc = max(1, min(T_CHUNK_TARGET, VMEM_STREAM_BUDGET // max(per_trial_bytes, 1)))
    best = 1
    for d in range(1, int(max_tc) + 1):
        if T % d == 0:
            best = d
    return best


@functools.partial(jax.jit,
                   static_argnames=("b_tile", "t_chunk", "pe_dtype", "act_dtype"))
def relative_rollout(q_values, context_value, rewards, uniforms, *,
                     b_tile=None, t_chunk=None,
                     pe_dtype=jnp.float32, act_dtype=jnp.int32):
    """Fused multi-trial Relative rollout.

    Layout (batch on lanes):
      q_values:      [A, B]     initial Q-values
      context_value: [1, B]     initial context value
      rewards:       [T, A, B]  rewards per trial
      uniforms:      [T, 1, B]  uniform draws per trial (action sampling)

    Returns:
      prediction_errors [T, A, B], context_prediction_errors [T, 1, B],
      actions [T, 1, B], final q_values [A, B], final context_value [1, B]
    """
    T, A, B = rewards.shape

    # --- tiling choices ------------------------------------------------------
    B_128 = max(LANE, ((B + LANE - 1) // LANE) * LANE)
    if b_tile is None:
        b_tile = _pick_b_tile(B_128)
    b_tile = max(LANE, (b_tile // LANE) * LANE)
    # Pad batch up to a multiple of b_tile: nb is exact, no lanes dropped.
    B_pad = ((B_128 + b_tile - 1) // b_tile) * b_tile
    nb = B_pad // b_tile

    if t_chunk is None:
        t_chunk = _pick_t_chunk(T, A, b_tile)
    assert T % t_chunk == 0, (T, t_chunk)
    nt = T // t_chunk

    # --- lane padding ---------------------------------------------------------
    if B_pad != B:
        pad = B_pad - B
        q_values = jnp.pad(q_values, ((0, 0), (0, pad)))
        context_value = jnp.pad(context_value, ((0, 0), (0, pad)))
        rewards = jnp.pad(rewards, ((0, 0), (0, 0), (0, pad)))
        # Pad uniforms with 1.0 so padded lanes resolve to the last action.
        uniforms = jnp.pad(uniforms, ((0, 0), (0, 0), (0, pad)),
                           constant_values=1.0)

    kernel = functools.partial(_relative_rollout_kernel,
                               num_actions=A, t_chunk=t_chunk)

    out_shapes = (
        jax.ShapeDtypeStruct((T, A, B_pad), pe_dtype),     # prediction_errors
        jax.ShapeDtypeStruct((T, 1, B_pad), pe_dtype),     # context_pred_errors
        jax.ShapeDtypeStruct((T, 1, B_pad), act_dtype),    # actions
        jax.ShapeDtypeStruct((A, B_pad), jnp.float32),     # final q_values
        jax.ShapeDtypeStruct((1, B_pad), jnp.float32),     # final context_value
    )

    in_specs = [
        pl.BlockSpec((A, b_tile), lambda b, t: (0, b)),               # q0 (resident)
        pl.BlockSpec((1, b_tile), lambda b, t: (0, b)),               # ctx0 (resident)
        pl.BlockSpec((t_chunk, A, b_tile), lambda b, t: (t, 0, b)),   # rewards (streamed)
        pl.BlockSpec((t_chunk, 1, b_tile), lambda b, t: (t, 0, b)),   # uniforms (streamed)
    ]
    out_specs = (
        pl.BlockSpec((t_chunk, A, b_tile), lambda b, t: (t, 0, b)),   # pe
        pl.BlockSpec((t_chunk, 1, b_tile), lambda b, t: (t, 0, b)),   # ctx pe
        pl.BlockSpec((t_chunk, 1, b_tile), lambda b, t: (t, 0, b)),   # actions
        pl.BlockSpec((A, b_tile), lambda b, t: (0, b)),               # final q (accum)
        pl.BlockSpec((1, b_tile), lambda b, t: (0, b)),               # final ctx (accum)
    )

    outs = pl.pallas_call(
        kernel,
        out_shape=out_shapes,
        grid=(nb, nt),
        in_specs=in_specs,
        out_specs=out_specs,
        compiler_params=pltpu.CompilerParams(
            dimension_semantics=("parallel", "arbitrary")),
    )(q_values, context_value, rewards, uniforms)

    pe, ctx_pe, act, q_final, ctx_final = outs
    if B_pad != B:
        pe = pe[..., :B]
        ctx_pe = ctx_pe[..., :B]
        act = act[..., :B]
        q_final = q_final[..., :B]
        ctx_final = ctx_final[..., :B]
    return pe, ctx_pe, act, q_final, ctx_final


def _reference_rollout(q0, ctx0, rewards, uniforms):
    """Plain-JAX per-trial rollout with the semantics of Relative.forward (learning)."""
    A = q0.shape[0]

    def step(carry, xs):
        q, ctx = carry
        r, u = xs
        context_reward = jnp.mean(r, axis=0, keepdims=True)
        pe = r - ctx - q
        ctx_pe = context_reward - ctx
        tq = jnp.exp((q - jnp.max(q, axis=0, keepdims=True)) / TEMPERATURE)
        prefix = jnp.cumsum(tq, axis=0)
        thresh = u * jnp.sum(tq, axis=0, keepdims=True)
        action = jnp.minimum(
            jnp.sum((prefix < thresh).astype(jnp.int32), axis=0, keepdims=True), A - 1)
        chosen = (lax.broadcasted_iota(jnp.int32, q.shape, 0) == action).astype(jnp.float32)
        lr = FACTUAL_LR * chosen + COUNTERFACTUAL_LR * (1.0 - chosen)
        q_new = DECAY_FACTOR * (q + lr * pe)
        ctx_new = DECAY_FACTOR * (ctx + CONTEXTUAL_LR * ctx_pe)
        return (q_new, ctx_new), (pe, ctx_pe, action)

    (qf, cf), (pe, ctx_pe, act) = lax.scan(step, (q0, ctx0), (rewards, uniforms))
    return pe, ctx_pe, act, qf, cf


if __name__ == "__main__":
    root_key = jax.random.PRNGKey(0)
    FEEDBACK = 1.0

    def make_inputs(key, T, A, B):
        k_prob, k_rew, k_q, k_ctx, k_u = jax.random.split(key, 5)
        # get_reward glue (stateless Bernoulli draw done in plain JAX):
        probabilities = jax.random.uniform(k_prob, (T, A, B), jnp.float32)
        reward_draws = jax.random.uniform(k_rew, (T, A, B), jnp.float32)
        rewards = (reward_draws < probabilities).astype(jnp.float32) * FEEDBACK
        q_values = NOVEL_VALUE + 0.1 * jax.random.normal(k_q, (A, B), jnp.float32)
        context_value = 0.1 * jax.random.normal(k_ctx, (1, B), jnp.float32)
        uniforms = jax.random.uniform(k_u, (T, 1, B), jnp.float32)
        return q_values, context_value, rewards, uniforms

    def check(key, T, A, B):
        q0, c0, r, u = make_inputs(key, T, A, B)
        outs = jax.block_until_ready(relative_rollout(q0, c0, r, u))
        pe, ctx_pe, act, qf, cf = outs
        assert pe.shape == (T, A, B) and ctx_pe.shape == (T, 1, B)
        assert act.shape == (T, 1, B) and act.dtype == jnp.int32
        assert qf.shape == (A, B) and cf.shape == (1, B)
        assert bool(jnp.all((act >= 0) & (act < A)))
        assert bool(jnp.all(jnp.isfinite(pe)))
        assert bool(jnp.all(jnp.isfinite(qf))) and bool(jnp.all(jnp.isfinite(cf)))

        # Pure-JAX reference. Sampled actions may disagree on a negligible set of
        # lanes where u lands within ~1 ulp of a softmax decision boundary
        # (EUP vs XLA exp); require near-total agreement and an exact-trajectory
        # match on agreeing lanes.
        pe_r, cpe_r, act_r, qf_r, cf_r = _reference_rollout(q0, c0, r, u)
        lane_ok = jnp.all(act == act_r, axis=(0, 1))
        frac = float(jnp.mean(lane_ok.astype(jnp.float32)))
        assert frac > 0.97, f"action agreement too low: {frac}"
        assert bool(jnp.allclose(pe[..., lane_ok], pe_r[..., lane_ok], atol=1e-5, rtol=1e-5))
        assert bool(jnp.allclose(ctx_pe[..., lane_ok], cpe_r[..., lane_ok], atol=1e-5, rtol=1e-5))
        assert bool(jnp.allclose(qf[..., lane_ok], qf_r[..., lane_ok], atol=1e-5, rtol=1e-5))
        assert bool(jnp.allclose(cf[..., lane_ok], cf_r[..., lane_ok], atol=1e-5, rtol=1e-5))

    # 8 trials, 4 stimuli/actions, 128 parallel episodes (single lane-dense tile).
    check(jax.random.fold_in(root_key, 0), T=8, A=4, B=128)
    # Ragged batch: exercises lane padding + multi-tile batch grid (nb >= 2).
    check(jax.random.fold_in(root_key, 1), T=6, A=4, B=200)

    print("KERNEL_OK")
</pallas_src>

<mosaic_0001>
module attributes {stable_mosaic.version = 11 : i64} {
  func.func @_relative_rollout_kernel(%arg0: i32, %arg1: i32, %arg2: memref<4x128xf32, #tpu.memory_space<vmem>>, %arg3: memref<1x128xf32, #tpu.memory_space<vmem>>, %arg4: memref<8x4x128xf32, #tpu.memory_space<vmem>>, %arg5: memref<8x1x128xf32, #tpu.memory_space<vmem>>, %arg6: memref<8x4x128xf32, #tpu.memory_space<vmem>>, %arg7: memref<8x1x128xf32, #tpu.memory_space<vmem>>, %arg8: memref<8x1x128xi32, #tpu.memory_space<vmem>>, %arg9: memref<4x128xf32, #tpu.memory_space<vmem>>, %arg10: memref<1x128xf32, #tpu.memory_space<vmem>>) attributes {dimension_semantics = [#tpu.dimension_semantics<parallel>, #tpu.dimension_semantics<arbitrary>], iteration_bounds = array<i64: 1, 1>, scalar_prefetch = 0 : i64, scratch_operands = 0 : i64, tpu.core_type = #tpu.core_type<tc>, window_params = [{transform_indices = @transform_0, window_bounds = array<i64: 4, 128>}, {transform_indices = @transform_1, window_bounds = array<i64: 1, 128>}, {transform_indices = @transform_2, window_bounds = array<i64: 8, 4, 128>}, {transform_indices = @transform_3, window_bounds = array<i64: 8, 1, 128>}, {transform_indices = @transform_4, window_bounds = array<i64: 8, 4, 128>}, {transform_indices = @transform_5, window_bounds = array<i64: 8, 1, 128>}, {transform_indices = @transform_6, window_bounds = array<i64: 8, 1, 128>}, {transform_indices = @transform_7, window_bounds = array<i64: 4, 128>}, {transform_indices = @transform_8, window_bounds = array<i64: 1, 128>}]} {
    %c0_i32 = arith.constant 0 : i32
    %0 = arith.cmpi eq, %arg1, %c0_i32 : i32
    %1 = arith.extui %0 : i1 to i32
    %c0_i32_0 = arith.constant 0 : i32
    %2 = arith.cmpi ne, %1, %c0_i32_0 : i32
    scf.if %2 {
      %c0_184 = arith.constant 0 : index
      %c0_185 = arith.constant 0 : index
      %591 = vector.load %arg2[%c0_184, %c0_185] : memref<4x128xf32, #tpu.memory_space<vmem>>, vector<4x128xf32>
      %c0_186 = arith.constant 0 : index
      %c0_187 = arith.constant 0 : index
      %592 = vector.load %arg9[%c0_186, %c0_187] : memref<4x128xf32, #tpu.memory_space<vmem>>, vector<4x128xf32>
      tpu.vector_store %arg9[%c0_186, %c0_187], %591 {strides = array<i32>} : memref<4x128xf32, #tpu.memory_space<vmem>>, vector<4x128xf32>,
      %c0_188 = arith.constant 0 : index
      %c0_189 = arith.constant 0 : index
      %593 = vector.load %arg3[%c0_188, %c0_189] : memref<1x128xf32, #tpu.memory_space<vmem>>, vector<1x128xf32>
      %c0_190 = arith.constant 0 : index
      %c0_191 = arith.constant 0 : index
      %594 = vector.load %arg10[%c0_190, %c0_191] : memref<1x128xf32, #tpu.memory_space<vmem>>, vector<1x128xf32>
      tpu.vector_store %arg10[%c0_190, %c0_191], %593 {strides = array<i32>} : memref<1x128xf32, #tpu.memory_space<vmem>>, vector<1x128xf32>,
    } else {
    }
    %c0 = arith.constant 0 : index
    %c0_1 = arith.constant 0 : index
    %3 = vector.load %arg9[%c0, %c0_1] : memref<4x128xf32, #tpu.memory_space<vmem>>, vector<4x128xf32>
    %c0_2 = arith.constant 0 : index
    %c0_3 = arith.constant 0 : index
    %4 = vector.load %arg10[%c0_2, %c0_3] : memref<1x128xf32, #tpu.memory_space<vmem>>, vector<1x128xf32>
    %c0_i32_4 = arith.constant 0 : i32
    %5 = arith.index_cast %c0_i32_4 : i32 to index
    %c0_5 = arith.constant 0 : index
    %c0_6 = arith.constant 0 : index
    %6 = vector.load %arg4[%5, %c0_5, %c0_6] : memref<8x4x128xf32, #tpu.memory_space<vmem>>, vector<1x4x128xf32>
    %7 = vector.shape_cast %6 : vector<1x4x128xf32> to vector<4x128xf32>
    %8 = arith.index_cast %c0_i32_4 : i32 to index
    %c0_7 = arith.constant 0 : index
    %c0_8 = arith.constant 0 : index
    %9 = vector.load %arg5[%8, %c0_7, %c0_8] : memref<8x1x128xf32, #tpu.memory_space<vmem>>, vector<1x1x128xf32>
    %10 = vector.shape_cast %9 : vector<1x1x128xf32> to vector<1x128xf32>
    %cst = arith.constant dense<0.000000e+00> : vector<128xf32>
    %11 = vector.multi_reduction <add>, %7, %cst [0] : vector<4x128xf32> to vector<128xf32>
    %12 = vector.shape_cast %11 : vector<128xf32> to vector<1x128xf32>
    %cst_9 = arith.constant 2.500000e-01 : f32
    %13 = vector.broadcast %cst_9 : f32 to vector<1x128xf32>
    %14 = arith.mulf %12, %13 : vector<1x128xf32>
    %15 = vector.broadcast %4 : vector<1x128xf32> to vector<4x128xf32>
    %16 = arith.subf %7, %15 : vector<4x128xf32>
    %17 = arith.subf %16, %3 : vector<4x128xf32>
    %18 = arith.subf %14, %4 : vector<1x128xf32>
    %cst_10 = arith.constant dense<0xFF800000> : vector<128xf32>
    %19 = vector.multi_reduction <maximumf>, %3, %cst_10 [0] : vector<4x128xf32> to vector<128xf32>
    %20 = vector.shape_cast %19 : vector<128xf32> to vector<1x128xf32>
    %21 = vector.broadcast %20 : vector<1x128xf32> to vector<4x128xf32>
    %22 = arith.subf %3, %21 : vector<4x128xf32>
    %cst_11 = arith.constant 2.000000e+00 : f32
    %23 = vector.broadcast %cst_11 : f32 to vector<4x128xf32>
    %24 = arith.mulf %22, %23 : vector<4x128xf32>
    %25 = math.exp %24 : vector<4x128xf32>
    %cst_12 = arith.constant dense<0.000000e+00> : vector<128xf32>
    %26 = vector.multi_reduction <add>, %25, %cst_12 [0] : vector<4x128xf32> to vector<128xf32>
    %27 = vector.shape_cast %26 : vector<128xf32> to vector<1x128xf32>
    %28 = arith.mulf %10, %27 : vector<1x128xf32>
    %29 = vector.extract_strided_slice %25 {offsets = [0, 0], sizes = [1, 128], strides = [1, 1]} : vector<4x128xf32> to vector<1x128xf32>
    %cst_13 = arith.constant 1.000000e+00 : f32
    %30 = vector.broadcast %cst_13 : f32 to vector<1x128xf32>
    %cst_14 = arith.constant 0.000000e+00 : f32
    %31 = vector.broadcast %cst_14 : f32 to vector<1x128xf32>
    %32 = arith.cmpf olt, %29, %28 : vector<1x128xf32>
    %33 = arith.extui %32 : vector<1x128xi1> to vector<1x128xi32>
    %34 = arith.sitofp %33 : vector<1x128xi32> to vector<1x128xf32>
    %35 = arith.subf %30, %34 : vector<1x128xf32>
    %36 = arith.addf %31, %34 : vector<1x128xf32>
    %37 = vector.extract_strided_slice %25 {offsets = [1, 0], sizes = [1, 128], strides = [1, 1]} : vector<4x128xf32> to vector<1x128xf32>
    %38 = arith.addf %29, %37 : vector<1x128xf32>
    %39 = arith.cmpf olt, %38, %28 : vector<1x128xf32>
    %40 = arith.extui %39 : vector<1x128xi1> to vector<1x128xi32>
    %41 = arith.sitofp %40 : vector<1x128xi32> to vector<1x128xf32>
    %42 = arith.subf %34, %41 : vector<1x128xf32>
    %43 = arith.addf %36, %41 : vector<1x128xf32>
    %44 = vector.extract_strided_slice %25 {offsets = [2, 0], sizes = [1, 128], strides = [1, 1]} : vector<4x128xf32> to vector<1x128xf32>
    %45 = arith.addf %38, %44 : vector<1x128xf32>
    %46 = arith.cmpf olt, %45, %28 : vector<1x128xf32>
    %47 = arith.extui %46 : vector<1x128xi1> to vector<1x128xi32>
    %48 = arith.sitofp %47 : vector<1x128xi32> to vector<1x128xf32>
    %49 = arith.subf %41, %48 : vector<1x128xf32>
    %50 = arith.addf %43, %48 : vector<1x128xf32>
    %51 = tpu.concatenate %35, %42, %49, %48 in 0 : vector<1x128xf32>, vector<1x128xf32>, vector<1x128xf32>, vector<1x128xf32> -> vector<4x128xf32>
    %cst_15 = arith.constant 1.500000e-01 : f32
    %52 = vector.broadcast %cst_15 : f32 to vector<4x128xf32>
    %53 = arith.mulf %52, %51 : vector<4x128xf32>
    %cst_16 = arith.constant 1.500000e-01 : f32
    %54 = vector.broadcast %cst_16 : f32 to vector<4x128xf32>
    %55 = arith.addf %54, %53 : vector<4x128xf32>
    %56 = arith.mulf %55, %17 : vector<4x128xf32>
    %57 = arith.addf %3, %56 : vector<4x128xf32>
    %cst_17 = arith.constant 0.949999988 : f32
    %58 = vector.broadcast %cst_17 : f32 to vector<4x128xf32>
    %59 = arith.mulf %58, %57 : vector<4x128xf32>
    %cst_18 = arith.constant 2.000000e-01 : f32
    %60 = vector.broadcast %cst_18 : f32 to vector<1x128xf32>
    %61 = arith.mulf %60, %18 : vector<1x128xf32>
    %62 = arith.addf %4, %61 : vector<1x128xf32>
    %cst_19 = arith.constant 0.949999988 : f32
    %63 = vector.broadcast %cst_19 : f32 to vector<1x128xf32>
    %64 = arith.mulf %63, %62 : vector<1x128xf32>
    %65 = arith.index_cast %c0_i32_4 : i32 to index
    %c0_20 = arith.constant 0 : index
    %c0_21 = arith.constant 0 : index
    %66 = vector.load %arg6[%65, %c0_20, %c0_21] : memref<8x4x128xf32, #tpu.memory_space<vmem>>, vector<1x4x128xf32>
    %67 = vector.shape_cast %66 : vector<1x4x128xf32> to vector<4x128xf32>
    %68 = vector.shape_cast %17 : vector<4x128xf32> to vector<1x4x128xf32>
    tpu.vector_store %arg6[%65, %c0_20, %c0_21], %68 {strides = array<i32>} : memref<8x4x128xf32, #tpu.memory_space<vmem>>, vector<1x4x128xf32>,
    %69 = arith.index_cast %c0_i32_4 : i32 to index
    %c0_22 = arith.constant 0 : index
    %c0_23 = arith.constant 0 : index
    %70 = vector.load %arg7[%69, %c0_22, %c0_23] : memref<8x1x128xf32, #tpu.memory_space<vmem>>, vector<1x1x128xf32>
    %71 = vector.shape_cast %70 : vector<1x1x128xf32> to vector<1x128xf32>
    %72 = vector.shape_cast %18 : vector<1x128xf32> to vector<1x1x128xf32>
    tpu.vector_store %arg7[%69, %c0_22, %c0_23], %72 {strides = array<i32>} : memref<8x1x128xf32, #tpu.memory_space<vmem>>, vector<1x1x128xf32>,
    %73 = arith.fptosi %50 : vector<1x128xf32> to vector<1x128xi32>
    %74 = arith.index_cast %c0_i32_4 : i32 to index
    %c0_24 = arith.constant 0 : index
    %c0_25 = arith.constant 0 : index
    %75 = vector.load %arg8[%74, %c0_24, %c0_25] : memref<8x1x128xi32, #tpu.memory_space<vmem>>, vector<1x1x128xi32>
    %76 = vector.shape_cast %75 : vector<1x1x128xi32> to vector<1x128xi32>
    %77 = vector.shape_cast %73 : vector<1x128xi32> to vector<1x1x128xi32>
    tpu.vector_store %arg8[%74, %c0_24, %c0_25], %77 {strides = array<i32>} : memref<8x1x128xi32, #tpu.memory_space<vmem>>, vector<1x1x128xi32>,
    %c1_i32 = arith.constant 1 : i32
    %78 = arith.index_cast %c1_i32 : i32 to index
    %c0_26 = arith.constant 0 : index
    %c0_27 = arith.constant 0 : index
    %79 = vector.load %arg4[%78, %c0_26, %c0_27] : memref<8x4x128xf32, #tpu.memory_space<vmem>>, vector<1x4x128xf32>
    %80 = vector.shape_cast %79 : vector<1x4x128xf32> to vector<4x128xf32>
    %81 = arith.index_cast %c1_i32 : i32 to index
    %c0_28 = arith.constant 0 : index
    %c0_29 = arith.constant 0 : index
    %82 = vector.load %arg5[%81, %c0_28, %c0_29] : memref<8x1x128xf32, #tpu.memory_space<vmem>>, vector<1x1x128xf32>
    %83 = vector.shape_cast %82 : vector<1x1x128xf32> to vector<1x128xf32>
    %cst_30 = arith.constant dense<0.000000e+00> : vector<128xf32>
    %84 = vector.multi_reduction <add>, %80, %cst_30 [0] : vector<4x128xf32> to vector<128xf32>
    %85 = vector.shape_cast %84 : vector<128xf32> to vector<1x128xf32>
    %cst_31 = arith.constant 2.500000e-01 : f32
    %86 = vector.broadcast %cst_31 : f32 to vector<1x128xf32>
    %87 = arith.mulf %85, %86 : vector<1x128xf32>
    %88 = vector.broadcast %64 : vector<1x128xf32> to vector<4x128xf32>
    %89 = arith.subf %80, %88 : vector<4x128xf32>
    %90 = arith.subf %89, %59 : vector<4x128xf32>
    %91 = arith.subf %87, %64 : vector<1x128xf32>
    %cst_32 = arith.constant dense<0xFF800000> : vector<128xf32>
    %92 = vector.multi_reduction <maximumf>, %59, %cst_32 [0] : vector<4x128xf32> to vector<128xf32>
    %93 = vector.shape_cast %92 : vector<128xf32> to vector<1x128xf32>
    %94 = vector.broadcast %93 : vector<1x128xf32> to vector<4x128xf32>
    %95 = arith.subf %59, %94 : vector<4x128xf32>
    %cst_33 = arith.constant 2.000000e+00 : f32
    %96 = vector.broadcast %cst_33 : f32 to vector<4x128xf32>
    %97 = arith.mulf %95, %96 : vector<4x128xf32>
    %98 = math.exp %97 : vector<4x128xf32>
    %cst_34 = arith.constant dense<0.000000e+00> : vector<128xf32>
    %99 = vector.multi_reduction <add>, %98, %cst_34 [0] : vector<4x128xf32> to vector<128xf32>
    %100 = vector.shape_cast %99 : vector<128xf32> to vector<1x128xf32>
    %101 = arith.mulf %83, %100 : vector<1x128xf32>
    %102 = vector.extract_strided_slice %98 {offsets = [0, 0], sizes = [1, 128], strides = [1, 1]} : vector<4x128xf32> to vector<1x128xf32>
    %cst_35 = arith.constant 1.000000e+00 : f32
    %103 = vector.broadcast %cst_35 : f32 to vector<1x128xf32>
    %cst_36 = arith.constant 0.000000e+00 : f32
    %104 = vector.broadcast %cst_36 : f32 to vector<1x128xf32>
    %105 = arith.cmpf olt, %102, %101 : vector<1x128xf32>
    %106 = arith.extui %105 : vector<1x128xi1> to vector<1x128xi32>
    %107 = arith.sitofp %106 : vector<1x128xi32> to vector<1x128xf32>
    %108 = arith.subf %103, %107 : vector<1x128xf32>
    %109 = arith.addf %104, %107 : vector<1x128xf32>
    %110 = vector.extract_strided_slice %98 {offsets = [1, 0], sizes = [1, 128], strides = [1, 1]} : vector<4x128xf32> to vector<1x128xf32>
    %111 = arith.addf %102, %110 : vector<1x128xf32>
    %112 = arith.cmpf olt, %111, %101 : vector<1x128xf32>
    %113 = arith.extui %112 : vector<1x128xi1> to vector<1x128xi32>
    %114 = arith.sitofp %113 : vector<1x128xi32> to vector<1x128xf32>
    %115 = arith.subf %107, %114 : vector<1x128xf32>
    %116 = arith.addf %109, %114 : vector<1x128xf32>
    %117 = vector.extract_strided_slice %98 {offsets = [2, 0], sizes = [1, 128], strides = [1, 1]} : vector<4x128xf32> to vector<1x128xf32>
    %118 = arith.addf %111, %117 : vector<1x128xf32>
    %119 = arith.cmpf olt, %118, %101 : vector<1x128xf32>
    %120 = arith.extui %119 : vector<1x128xi1> to vector<1x128xi32>
    %121 = arith.sitofp %120 : vector<1x128xi32> to vector<1x128xf32>
    %122 = arith.subf %114, %121 : vector<1x128xf32>
    %123 = arith.addf %116, %121 : vector<1x128xf32>
    %124 = tpu.concatenate %108, %115, %122, %121 in 0 : vector<1x128xf32>, vector<1x128xf32>, vector<1x128xf32>, vector<1x128xf32> -> vector<4x128xf32>
    %cst_37 = arith.constant 1.500000e-01 : f32
    %125 = vector.broadcast %cst_37 : f32 to vector<4x128xf32>
    %126 = arith.mulf %125, %124 : vector<4x128xf32>
    %cst_38 = arith.constant 1.500000e-01 : f32
    %127 = vector.broadcast %cst_38 : f32 to vector<4x128xf32>
    %128 = arith.addf %127, %126 : vector<4x128xf32>
    %129 = arith.mulf %128, %90 : vector<4x128xf32>
    %130 = arith.addf %59, %129 : vector<4x128xf32>
    %cst_39 = arith.constant 0.949999988 : f32
    %131 = vector.broadcast %cst_39 : f32 to vector<4x128xf32>
    %132 = arith.mulf %131, %130 : vector<4x128xf32>
    %cst_40 = arith.constant 2.000000e-01 : f32
    %133 = vector.broadcast %cst_40 : f32 to vector<1x128xf32>
    %134 = arith.mulf %133, %91 : vector<1x128xf32>
    %135 = arith.addf %64, %134 : vector<1x128xf32>
    %cst_41 = arith.constant 0.949999988 : f32
    %136 = vector.broadcast %cst_41 : f32 to vector<1x128xf32>
    %137 = arith.mulf %136, %135 : vector<1x128xf32>
    %138 = arith.index_cast %c1_i32 : i32 to index
    %c0_42 = arith.constant 0 : index
    %c0_43 = arith.constant 0 : index
    %139 = vector.load %arg6[%138, %c0_42, %c0_43] : memref<8x4x128xf32, #tpu.memory_space<vmem>>, vector<1x4x128xf32>
    %140 = vector.shape_cast %139 : vector<1x4x128xf32> to vector<4x128xf32>
    %141 = vector.shape_cast %90 : vector<4x128xf32> to vector<1x4x128xf32>
    tpu.vector_store %arg6[%138, %c0_42, %c0_43], %141 {strides = array<i32>} : memref<8x4x128xf32, #tpu.memory_space<vmem>>, vector<1x4x128xf32>,
    %142 = arith.index_cast %c1_i32 : i32 to index
    %c0_44 = arith.constant 0 : index
    %c0_45 = arith.constant 0 : index
    %143 = vector.load %arg7[%142, %c0_44, %c0_45] : memref<8x1x128xf32, #tpu.memory_space<vmem>>, vector<1x1x128xf32>
    %144 = vector.shape_cast %143 : vector<1x1x128xf32> to vector<1x128xf32>
    %145 = vector.shape_cast %91 : vector<1x128xf32> to vector<1x1x128xf32>
    tpu.vector_store %arg7[%142, %c0_44, %c0_45], %145 {strides = array<i32>} : memref<8x1x128xf32, #tpu.memory_space<vmem>>, vector<1x1x128xf32>,
    %146 = arith.fptosi %123 : vector<1x128xf32> to vector<1x128xi32>
    %147 = arith.index_cast %c1_i32 : i32 to index
    %c0_46 = arith.constant 0 : index
    %c0_47 = arith.constant 0 : index
    %148 = vector.load %arg8[%147, %c0_46, %c0_47] : memref<8x1x128xi32, #tpu.memory_space<vmem>>, vector<1x1x128xi32>
    %149 = vector.shape_cast %148 : vector<1x1x128xi32> to vector<1x128xi32>
    %150 = vector.shape_cast %146 : vector<1x128xi32> to vector<1x1x128xi32>
    tpu.vector_store %arg8[%147, %c0_46, %c0_47], %150 {strides = array<i32>} : memref<8x1x128xi32, #tpu.memory_space<vmem>>, vector<1x1x128xi32>,
    %c2_i32 = arith.constant 2 : i32
    %151 = arith.index_cast %c2_i32 : i32 to index
    %c0_48 = arith.constant 0 : index
    %c0_49 = arith.constant 0 : index
    %152 = vector.load %arg4[%151, %c0_48, %c0_49] : memref<8x4x128xf32, #tpu.memory_space<vmem>>, vector<1x4x128xf32>
    %153 = vector.shape_cast %152 : vector<1x4x128xf32> to vector<4x128xf32>
    %154 = arith.index_cast %c2_i32 : i32 to index
    %c0_50 = arith.constant 0 : index
    %c0_51 = arith.constant 0 : index
    %155 = vector.load %arg5[%154, %c0_50, %c0_51] : memref<8x1x128xf32, #tpu.memory_space<vmem>>, vector<1x1x128xf32>
    %156 = vector.shape_cast %155 : vector<1x1x128xf32> to vector<1x128xf32>
    %cst_52 = arith.constant dense<0.000000e+00> : vector<128xf32>
    %157 = vector.multi_reduction <add>, %153, %cst_52 [0] : vector<4x128xf32> to vector<128xf32>
    %158 = vector.shape_cast %157 : vector<128xf32> to vector<1x128xf32>
    %cst_53 = arith.constant 2.500000e-01 : f32
    %159 = vector.broadcast %cst_53 : f32 to vector<1x128xf32>
    %160 = arith.mulf %158, %159 : vector<1x128xf32>
    %161 = vector.broadcast %137 : vector<1x128xf32> to vector<4x128xf32>
    %162 = arith.subf %153, %161 : vector<4x128xf32>
    %163 = arith.subf %162, %132 : vector<4x128xf32>
    %164 = arith.subf %160, %137 : vector<1x128xf32>
    %cst_54 = arith.constant dense<0xFF800000> : vector<128xf32>
    %165 = vector.multi_reduction <maximumf>, %132, %cst_54 [0] : vector<4x128xf32> to vector<128xf32>
    %166 = vector.shape_cast %165 : vector<128xf32> to vector<1x128xf32>
    %167 = vector.broadcast %166 : vector<1x128xf32> to vector<4x128xf32>
    %168 = arith.subf %132, %167 : vector<4x128xf32>
    %cst_55 = arith.constant 2.000000e+00 : f32
    %169 = vector.broadcast %cst_55 : f32 to vector<4x128xf32>
    %170 = arith.mulf %168, %169 : vector<4x128xf32>
    %171 = math.exp %170 : vector<4x128xf32>
    %cst_56 = arith.constant dense<0.000000e+00> : vector<128xf32>
    %172 = vector.multi_reduction <add>, %171, %cst_56 [0] : vector<4x128xf32> to vector<128xf32>
    %173 = vector.shape_cast %172 : vector<128xf32> to vector<1x128xf32>
    %174 = arith.mulf %156, %173 : vector<1x128xf32>
    %175 = vector.extract_strided_slice %171 {offsets = [0, 0], sizes = [1, 128], strides = [1, 1]} : vector<4x128xf32> to vector<1x128xf32>
    %cst_57 = arith.constant 1.000000e+00 : f32
    %176 = vector.broadcast %cst_57 : f32 to vector<1x128xf32>
    %cst_58 = arith.constant 0.000000e+00 : f32
    %177 = vector.broadcast %cst_58 : f32 to vector<1x128xf32>
    %178 = arith.cmpf olt, %175, %174 : vector<1x128xf32>
    %179 = arith.extui %178 : vector<1x128xi1> to vector<1x128xi32>
    %180 = arith.sitofp %179 : vector<1x128xi32> to vector<1x128xf32>
    %181 = arith.subf %176, %180 : vector<1x128xf32>
    %182 = arith.addf %177, %180 : vector<1x128xf32>
    %183 = vector.extract_strided_slice %171 {offsets = [1, 0], sizes = [1, 128], strides = [1, 1]} : vector<4x128xf32> to vector<1x128xf32>
    %184 = arith.addf %175, %183 : vector<1x128xf32>
    %185 = arith.cmpf olt, %184, %174 : vector<1x128xf32>
    %186 = arith.extui %185 : vector<1x128xi1> to vector<1x128xi32>
    %187 = arith.sitofp %186 : vector<1x128xi32> to vector<1x128xf32>
    %188 = arith.subf %180, %187 : vector<1x128xf32>
    %189 = arith.addf %182, %187 : vector<1x128xf32>
    %190 = vector.extract_strided_slice %171 {offsets = [2, 0], sizes = [1, 128], strides = [1, 1]} : vector<4x128xf32> to vector<1x128xf32>
    %191 = arith.addf %184, %190 : vector<1x128xf32>
    %192 = arith.cmpf olt, %191, %174 : vector<1x128xf32>
    %193 = arith.extui %192 : vector<1x128xi1> to vector<1x128xi32>
    %194 = arith.sitofp %193 : vector<1x128xi32> to vector<1x128xf32>
    %195 = arith.subf %187, %194 : vector<1x128xf32>
    %196 = arith.addf %189, %194 : vector<1x128xf32>
    %197 = tpu.concatenate %181, %188, %195, %194 in 0 : vector<1x128xf32>, vector<1x128xf32>, vector<1x128xf32>, vector<1x128xf32> -> vector<4x128xf32>
    %cst_59 = arith.constant 1.500000e-01 : f32
    %198 = vector.broadcast %cst_59 : f32 to vector<4x128xf32>
    %199 = arith.mulf %198, %197 : vector<4x128xf32>
    %cst_60 = arith.constant 1.500000e-01 : f32
    %200 = vector.broadcast %cst_60 : f32 to vector<4x128xf32>
    %201 = arith.addf %200, %199 : vector<4x128xf32>
    %202 = arith.mulf %201, %163 : vector<4x128xf32>
    %203 = arith.addf %132, %202 : vector<4x128xf32>
    %cst_61 = arith.constant 0.949999988 : f32
    %204 = vector.broadcast %cst_61 : f32 to vector<4x128xf32>
    %205 = arith.mulf %204, %203 : vector<4x128xf32>
    %cst_62 = arith.constant 2.000000e-01 : f32
    %206 = vector.broadcast %cst_62 : f32 to vector<1x128xf32>
    %207 = arith.mulf %206, %164 : vector<1x128xf32>
    %208 = arith.addf %137, %207 : vector<1x128xf32>
    %cst_63 = arith.constant 0.949999988 : f32
    %209 = vector.broadcast %cst_63 : f32 to vector<1x128xf32>
    %210 = arith.mulf %209, %208 : vector<1x128xf32>
    %211 = arith.index_cast %c2_i32 : i32 to index
    %c0_64 = arith.constant 0 : index
    %c0_65 = arith.constant 0 : index
    %212 = vector.load %arg6[%211, %c0_64, %c0_65] : memref<8x4x128xf32, #tpu.memory_space<vmem>>, vector<1x4x128xf32>
    %213 = vector.shape_cast %212 : vector<1x4x128xf32> to vector<4x128xf32>
    %214 = vector.shape_cast %163 : vector<4x128xf32> to vector<1x4x128xf32>
    tpu.vector_store %arg6[%211, %c0_64, %c0_65], %214 {strides = array<i32>} : memref<8x4x128xf32, #tpu.memory_space<vmem>>, vector<1x4x128xf32>,
    %215 = arith.index_cast %c2_i32 : i32 to index
    %c0_66 = arith.constant 0 : index
    %c0_67 = arith.constant 0 : index
    %216 = vector.load %arg7[%215, %c0_66, %c0_67] : memref<8x1x128xf32, #tpu.memory_space<vmem>>, vector<1x1x128xf32>
    %217 = vector.shape_cast %216 : vector<1x1x128xf32> to vector<1x128xf32>
    %218 = vector.shape_cast %164 : vector<1x128xf32> to vector<1x1x128xf32>
    tpu.vector_store %arg7[%215, %c0_66, %c0_67], %218 {strides = array<i32>} : memref<8x1x128xf32, #tpu.memory_space<vmem>>, vector<1x1x128xf32>,
    %219 = arith.fptosi %196 : vector<1x128xf32> to vector<1x128xi32>
    %220 = arith.index_cast %c2_i32 : i32 to index
    %c0_68 = arith.constant 0 : index
    %c0_69 = arith.constant 0 : index
    %221 = vector.load %arg8[%220, %c0_68, %c0_69] : memref<8x1x128xi32, #tpu.memory_space<vmem>>, vector<1x1x128xi32>
    %222 = vector.shape_cast %221 : vector<1x1x128xi32> to vector<1x128xi32>
    %223 = vector.shape_cast %219 : vector<1x128xi32> to vector<1x1x128xi32>
    tpu.vector_store %arg8[%220, %c0_68, %c0_69], %223 {strides = array<i32>} : memref<8x1x128xi32, #tpu.memory_space<vmem>>, vector<1x1x128xi32>,
    %c3_i32 = arith.constant 3 : i32
    %224 = arith.index_cast %c3_i32 : i32 to index
    %c0_70 = arith.constant 0 : index
    %c0_71 = arith.constant 0 : index
    %225 = vector.load %arg4[%224, %c0_70, %c0_71] : memref<8x4x128xf32, #tpu.memory_space<vmem>>, vector<1x4x128xf32>
    %226 = vector.shape_cast %225 : vector<1x4x128xf32> to vector<4x128xf32>
    %227 = arith.index_cast %c3_i32 : i32 to index
    %c0_72 = arith.constant 0 : index
    %c0_73 = arith.constant 0 : index
    %228 = vector.load %arg5[%227, %c0_72, %c0_73] : memref<8x1x128xf32, #tpu.memory_space<vmem>>, vector<1x1x128xf32>
    %229 = vector.shape_cast %228 : vector<1x1x128xf32> to vector<1x128xf32>
    %cst_74 = arith.constant dense<0.000000e+00> : vector<128xf32>
    %230 = vector.multi_reduction <add>, %226, %cst_74 [0] : vector<4x128xf32> to vector<128xf32>
    %231 = vector.shape_cast %230 : vector<128xf32> to vector<1x128xf32>
    %cst_75 = arith.constant 2.500000e-01 : f32
    %232 = vector.broadcast %cst_75 : f32 to vector<1x128xf32>
    %233 = arith.mulf %231, %232 : vector<1x128xf32>
    %234 = vector.broadcast %210 : vector<1x128xf32> to vector<4x128xf32>
    %235 = arith.subf %226, %234 : vector<4x128xf32>
    %236 = arith.subf %235, %205 : vector<4x128xf32>
    %237 = arith.subf %233, %210 : vector<1x128xf32>
    %cst_76 = arith.constant dense<0xFF800000> : vector<128xf32>
    %238 = vector.multi_reduction <maximumf>, %205, %cst_76 [0] : vector<4x128xf32> to vector<128xf32>
    %239 = vector.shape_cast %238 : vector<128xf32> to vector<1x128xf32>
    %240 = vector.broadcast %239 : vector<1x128xf32> to vector<4x128xf32>
    %241 = arith.subf %205, %240 : vector<4x128xf32>
    %cst_77 = arith.constant 2.000000e+00 : f32
    %242 = vector.broadcast %cst_77 : f32 to vector<4x128xf32>
    %243 = arith.mulf %241, %242 : vector<4x128xf32>
    %244 = math.exp %243 : vector<4x128xf32>
    %cst_78 = arith.constant dense<0.000000e+00> : vector<128xf32>
    %245 = vector.multi_reduction <add>, %244, %cst_78 [0] : vector<4x128xf32> to vector<128xf32>
    %246 = vector.shape_cast %245 : vector<128xf32> to vector<1x128xf32>
    %247 = arith.mulf %229, %246 : vector<1x128xf32>
    %248 = vector.extract_strided_slice %244 {offsets = [0, 0], sizes = [1, 128], strides = [1, 1]} : vector<4x128xf32> to vector<1x128xf32>
    %cst_79 = arith.constant 1.000000e+00 : f32
    %249 = vector.broadcast %cst_79 : f32 to vector<1x128xf32>
    %cst_80 = arith.constant 0.000000e+00 : f32
    %250 = vector.broadcast %cst_80 : f32 to vector<1x128xf32>
    %251 = arith.cmpf olt, %248, %247 : vector<1x128xf32>
    %252 = arith.extui %251 : vector<1x128xi1> to vector<1x128xi32>
    %253 = arith.sitofp %252 : vector<1x128xi32> to vector<1x128xf32>
    %254 = arith.subf %249, %253 : vector<1x128xf32>
    %255 = arith.addf %250, %253 : vector<1x128xf32>
    %256 = vector.extract_strided_slice %244 {offsets = [1, 0], sizes = [1, 128], strides = [1, 1]} : vector<4x128xf32> to vector<1x128xf32>
    %257 = arith.addf %248, %256 : vector<1x128xf32>
    %258 = arith.cmpf olt, %257, %247 : vector<1x128xf32>
    %259 = arith.extui %258 : vector<1x128xi1> to vector<1x128xi32>
    %260 = arith.sitofp %259 : vector<1x128xi32> to vector<1x128xf32>
    %261 = arith.subf %253, %260 : vector<1x128xf32>
    %262 = arith.addf %255, %260 : vector<1x128xf32>
    %263 = vector.extract_strided_slice %244 {offsets = [2, 0], sizes = [1, 128], strides = [1, 1]} : vector<4x128xf32> to vector<1x128xf32>
    %264 = arith.addf %257, %263 : vector<1x128xf32>
    %265 = arith.cmpf olt, %264, %247 : vector<1x128xf32>
    %266 = arith.extui %265 : vector<1x128xi1> to vector<1x128xi32>
    %267 = arith.sitofp %266 : vector<1x128xi32> to vector<1x128xf32>
    %268 = arith.subf %260, %267 : vector<1x128xf32>
    %269 = arith.addf %262, %267 : vector<1x128xf32>
    %270 = tpu.concatenate %254, %261, %268, %267 in 0 : vector<1x128xf32>, vector<1x128xf32>, vector<1x128xf32>, vector<1x128xf32> -> vector<4x128xf32>
    %cst_81 = arith.constant 1.500000e-01 : f32
    %271 = vector.broadcast %cst_81 : f32 to vector<4x128xf32>
    %272 = arith.mulf %271, %270 : vector<4x128xf32>
    %cst_82 = arith.constant 1.500000e-01 : f32
    %273 = vector.broadcast %cst_82 : f32 to vector<4x128xf32>
    %274 = arith.addf %273, %272 : vector<4x128xf32>
    %275 = arith.mulf %274, %236 : vector<4x128xf32>
    %276 = arith.addf %205, %275 : vector<4x128xf32>
    %cst_83 = arith.constant 0.949999988 : f32
    %277 = vector.broadcast %cst_83 : f32 to vector<4x128xf32>
    %278 = arith.mulf %277, %276 : vector<4x128xf32>
    %cst_84 = arith.constant 2.000000e-01 : f32
    %279 = vector.broadcast %cst_84 : f32 to vector<1x128xf32>
    %280 = arith.mulf %279, %237 : vector<1x128xf32>
    %281 = arith.addf %210, %280 : vector<1x128xf32>
    %cst_85 = arith.constant 0.949999988 : f32
    %282 = vector.broadcast %cst_85 : f32 to vector<1x128xf32>
    %283 = arith.mulf %282, %281 : vector<1x128xf32>
    %284 = arith.index_cast %c3_i32 : i32 to index
    %c0_86 = arith.constant 0 : index
    %c0_87 = arith.constant 0 : index
    %285 = vector.load %arg6[%284, %c0_86, %c0_87] : memref<8x4x128xf32, #tpu.memory_space<vmem>>, vector<1x4x128xf32>
    %286 = vector.shape_cast %285 : vector<1x4x128xf32> to vector<4x128xf32>
    %287 = vector.shape_cast %236 : vector<4x128xf32> to vector<1x4x128xf32>
    tpu.vector_store %arg6[%284, %c0_86, %c0_87], %287 {strides = array<i32>} : memref<8x4x128xf32, #tpu.memory_space<vmem>>, vector<1x4x128xf32>,
    %288 = arith.index_cast %c3_i32 : i32 to index
    %c0_88 = arith.constant 0 : index
    %c0_89 = arith.constant 0 : index
    %289 = vector.load %arg7[%288, %c0_88, %c0_89] : memref<8x1x128xf32, #tpu.memory_space<vmem>>, vector<1x1x128xf32>
    %290 = vector.shape_cast %289 : vector<1x1x128xf32> to vector<1x128xf32>
    %291 = vector.shape_cast %237 : vector<1x128xf32> to vector<1x1x128xf32>
    tpu.vector_store %arg7[%288, %c0_88, %c0_89], %291 {strides = array<i32>} : memref<8x1x128xf32, #tpu.memory_space<vmem>>, vector<1x1x128xf32>,
    %292 = arith.fptosi %269 : vector<1x128xf32> to vector<1x128xi32>
    %293 = arith.index_cast %c3_i32 : i32 to index
    %c0_90 = arith.constant 0 : index
    %c0_91 = arith.constant 0 : index
    %294 = vector.load %arg8[%293, %c0_90, %c0_91] : memref<8x1x128xi32, #tpu.memory_space<vmem>>, vector<1x1x128xi32>
    %295 = vector.shape_cast %294 : vector<1x1x128xi32> to vector<1x128xi32>
    %296 = vector.shape_cast %292 : vector<1x128xi32> to vector<1x1x128xi32>
    tpu.vector_store %arg8[%293, %c0_90, %c0_91], %296 {strides = array<i32>} : memref<8x1x128xi32, #tpu.memory_space<vmem>>, vector<1x1x128xi32>,
    %c4_i32 = arith.constant 4 : i32
    %297 = arith.index_cast %c4_i32 : i32 to index
    %c0_92 = arith.constant 0 : index
    %c0_93 = arith.constant 0 : index
    %298 = vector.load %arg4[%297, %c0_92, %c0_93] : memref<8x4x128xf32, #tpu.memory_space<vmem>>, vector<1x4x128xf32>
    %299 = vector.shape_cast %298 : vector<1x4x128xf32> to vector<4x128xf32>
    %300 = arith.index_cast %c4_i32 : i32 to index
    %c0_94 = arith.constant 0 : index
    %c0_95 = arith.constant 0 : index
    %301 = vector.load %arg5[%300, %c0_94, %c0_95] : memref<8x1x128xf32, #tpu.memory_space<vmem>>, vector<1x1x128xf32>
    %302 = vector.shape_cast %301 : vector<1x1x128xf32> to vector<1x128xf32>
    %cst_96 = arith.constant dense<0.000000e+00> : vector<128xf32>
    %303 = vector.multi_reduction <add>, %299, %cst_96 [0] : vector<4x128xf32> to vector<128xf32>
    %304 = vector.shape_cast %303 : vector<128xf32> to vector<1x128xf32>
    %cst_97 = arith.constant 2.500000e-01 : f32
    %305 = vector.broadcast %cst_97 : f32 to vector<1x128xf32>
    %306 = arith.mulf %304, %305 : vector<1x128xf32>
    %307 = vector.broadcast %283 : vector<1x128xf32> to vector<4x128xf32>
    %308 = arith.subf %299, %307 : vector<4x128xf32>
    %309 = arith.subf %308, %278 : vector<4x128xf32>
    %310 = arith.subf %306, %283 : vector<1x128xf32>
    %cst_98 = arith.constant dense<0xFF800000> : vector<128xf32>
    %311 = vector.multi_reduction <maximumf>, %278, %cst_98 [0] : vector<4x128xf32> to vector<128xf32>
    %312 = vector.shape_cast %311 : vector<128xf32> to vector<1x128xf32>
    %313 = vector.broadcast %312 : vector<1x128xf32> to vector<4x128xf32>
    %314 = arith.subf %278, %313 : vector<4x128xf32>
    %cst_99 = arith.constant 2.000000e+00 : f32
    %315 = vector.broadcast %cst_99 : f32 to vector<4x128xf32>
    %316 = arith.mulf %314, %315 : vector<4x128xf32>
    %317 = math.exp %316 : vector<4x128xf32>
    %cst_100 = arith.constant dense<0.000000e+00> : vector<128xf32>
    %318 = vector.multi_reduction <add>, %317, %cst_100 [0] : vector<4x128xf32> to vector<128xf32>
    %319 = vector.shape_cast %318 : vector<128xf32> to vector<1x128xf32>
    %320 = arith.mulf %302, %319 : vector<1x128xf32>
    %321 = vector.extract_strided_slice %317 {offsets = [0, 0], sizes = [1, 128], strides = [1, 1]} : vector<4x128xf32> to vector<1x128xf32>
    %cst_101 = arith.constant 1.000000e+00 : f32
    %322 = vector.broadcast %cst_101 : f32 to vector<1x128xf32>
    %cst_102 = arith.constant 0.000000e+00 : f32
    %323 = vector.broadcast %cst_102 : f32 to vector<1x128xf32>
    %324 = arith.cmpf olt, %321, %320 : vector<1x128xf32>
    %325 = arith.extui %324 : vector<1x128xi1> to vector<1x128xi32>
    %326 = arith.sitofp %325 : vector<1x128xi32> to vector<1x128xf32>
    %327 = arith.subf %322, %326 : vector<1x128xf32>
    %328 = arith.addf %323, %326 : vector<1x128xf32>
    %329 = vector.extract_strided_slice %317 {offsets = [1, 0], sizes = [1, 128], strides = [1, 1]} : vector<4x128xf32> to vector<1x128xf32>
    %330 = arith.addf %321, %329 : vector<1x128xf32>
    %331 = arith.cmpf olt, %330, %320 : vector<1x128xf32>
    %332 = arith.extui %331 : vector<1x128xi1> to vector<1x128xi32>
    %333 = arith.sitofp %332 : vector<1x128xi32> to vector<1x128xf32>
    %334 = arith.subf %326, %333 : vector<1x128xf32>
    %335 = arith.addf %328, %333 : vector<1x128xf32>
    %336 = vector.extract_strided_slice %317 {offsets = [2, 0], sizes = [1, 128], strides = [1, 1]} : vector<4x128xf32> to vector<1x128xf32>
    %337 = arith.addf %330, %336 : vector<1x128xf32>
    %338 = arith.cmpf olt, %337, %320 : vector<1x128xf32>
    %339 = arith.extui %338 : vector<1x128xi1> to vector<1x128xi32>
    %340 = arith.sitofp %339 : vector<1x128xi32> to vector<1x128xf32>
    %341 = arith.subf %333, %340 : vector<1x128xf32>
    %342 = arith.addf %335, %340 : vector<1x128xf32>
    %343 = tpu.concatenate %327, %334, %341, %340 in 0 : vector<1x128xf32>, vector<1x128xf32>, vector<1x128xf32>, vector<1x128xf32> -> vector<4x128xf32>
    %cst_103 = arith.constant 1.500000e-01 : f32
    %344 = vector.broadcast %cst_103 : f32 to vector<4x128xf32>
    %345 = arith.mulf %344, %343 : vector<4x128xf32>
    %cst_104 = arith.constant 1.500000e-01 : f32
    %346 = vector.broadcast %cst_104 : f32 to vector<4x128xf32>
    %347 = arith.addf %346, %345 : vector<4x128xf32>
    %348 = arith.mulf %347, %309 : vector<4x128xf32>
    %349 = arith.addf %278, %348 : vector<4x128xf32>
    %cst_105 = arith.constant 0.949999988 : f32
    %350 = vector.broadcast %cst_105 : f32 to vector<4x128xf32>
    %351 = arith.mulf %350, %349 : vector<4x128xf32>
    %cst_106 = arith.constant 2.000000e-01 : f32
    %352 = vector.broadcast %cst_106 : f32 to vector<1x128xf32>
    %353 = arith.mulf %352, %310 : vector<1x128xf32>
    %354 = arith.addf %283, %353 : vector<1x128xf32>
    %cst_107 = arith.constant 0.949999988 : f32
    %355 = vector.broadcast %cst_107 : f32 to vector<1x128xf32>
    %356 = arith.mulf %355, %354 : vector<1x128xf32>
    %357 = arith.index_cast %c4_i32 : i32 to index
    %c0_108 = arith.constant 0 : index
    %c0_109 = arith.constant 0 : index
    %358 = vector.load %arg6[%357, %c0_108, %c0_109] : memref<8x4x128xf32, #tpu.memory_space<vmem>>, vector<1x4x128xf32>
    %359 = vector.shape_cast %358 : vector<1x4x128xf32> to vector<4x128xf32>
    %360 = vector.shape_cast %309 : vector<4x128xf32> to vector<1x4x128xf32>
    tpu.vector_store %arg6[%357, %c0_108, %c0_109], %360 {strides = array<i32>} : memref<8x4x128xf32, #tpu.memory_space<vmem>>, vector<1x4x128xf32>,
    %361 = arith.index_cast %c4_i32 : i32 to index
    %c0_110 = arith.constant 0 : index
    %c0_111 = arith.constant 0 : index
    %362 = vector.load %arg7[%361, %c0_110, %c0_111] : memref<8x1x128xf32, #tpu.memory_space<vmem>>, vector<1x1x128xf32>
    %363 = vector.shape_cast %362 : vector<1x1x128xf32> to vector<1x128xf32>
    %364 = vector.shape_cast %310 : vector<1x128xf32> to vector<1x1x128xf32>
    tpu.vector_store %arg7[%361, %c0_110, %c0_111], %364 {strides = array<i32>} : memref<8x1x128xf32, #tpu.memory_space<vmem>>, vector<1x1x128xf32>,
    %365 = arith.fptosi %342 : vector<1x128xf32> to vector<1x128xi32>
    %366 = arith.index_cast %c4_i32 : i32 to index
    %c0_112 = arith.constant 0 : index
    %c0_113 = arith.constant 0 : index
    %367 = vector.load %arg8[%366, %c0_112, %c0_113] : memref<8x1x128xi32, #tpu.memory_space<vmem>>, vector<1x1x128xi32>
    %368 = vector.shape_cast %367 : vector<1x1x128xi32> to vector<1x128xi32>
    %369 = vector.shape_cast %365 : vector<1x128xi32> to vector<1x1x128xi32>
    tpu.vector_store %arg8[%366, %c0_112, %c0_113], %369 {strides = array<i32>} : memref<8x1x128xi32, #tpu.memory_space<vmem>>, vector<1x1x128xi32>,
    %c5_i32 = arith.constant 5 : i32
    %370 = arith.index_cast %c5_i32 : i32 to index
    %c0_114 = arith.constant 0 : index
    %c0_115 = arith.constant 0 : index
    %371 = vector.load %arg4[%370, %c0_114, %c0_115] : memref<8x4x128xf32, #tpu.memory_space<vmem>>, vector<1x4x128xf32>
    %372 = vector.shape_cast %371 : vector<1x4x128xf32> to vector<4x128xf32>
    %373 = arith.index_cast %c5_i32 : i32 to index
    %c0_116 = arith.constant 0 : index
    %c0_117 = arith.constant 0 : index
    %374 = vector.load %arg5[%373, %c0_116, %c0_117] : memref<8x1x128xf32, #tpu.memory_space<vmem>>, vector<1x1x128xf32>
    %375 = vector.shape_cast %374 : vector<1x1x128xf32> to vector<1x128xf32>
    %cst_118 = arith.constant dense<0.000000e+00> : vector<128xf32>
    %376 = vector.multi_reduction <add>, %372, %cst_118 [0] : vector<4x128xf32> to vector<128xf32>
    %377 = vector.shape_cast %376 : vector<128xf32> to vector<1x128xf32>
    %cst_119 = arith.constant 2.500000e-01 : f32
    %378 = vector.broadcast %cst_119 : f32 to vector<1x128xf32>
    %379 = arith.mulf %377, %378 : vector<1x128xf32>
    %380 = vector.broadcast %356 : vector<1x128xf32> to vector<4x128xf32>
    %381 = arith.subf %372, %380 : vector<4x128xf32>
    %382 = arith.subf %381, %351 : vector<4x128xf32>
    %383 = arith.subf %379, %356 : vector<1x128xf32>
    %cst_120 = arith.constant dense<0xFF800000> : vector<128xf32>
    %384 = vector.multi_reduction <maximumf>, %351, %cst_120 [0] : vector<4x128xf32> to vector<128xf32>
    %385 = vector.shape_cast %384 : vector<128xf32> to vector<1x128xf32>
    %386 = vector.broadcast %385 : vector<1x128xf32> to vector<4x128xf32>
    %387 = arith.subf %351, %386 : vector<4x128xf32>
    %cst_121 = arith.constant 2.000000e+00 : f32
    %388 = vector.broadcast %cst_121 : f32 to vector<4x128xf32>
    %389 = arith.mulf %387, %388 : vector<4x128xf32>
    %390 = math.exp %389 : vector<4x128xf32>
    %cst_122 = arith.constant dense<0.000000e+00> : vector<128xf32>
    %391 = vector.multi_reduction <add>, %390, %cst_122 [0] : vector<4x128xf32> to vector<128xf32>
    %392 = vector.shape_cast %391 : vector<128xf32> to vector<1x128xf32>
    %393 = arith.mulf %375, %392 : vector<1x128xf32>
    %394 = vector.extract_strided_slice %390 {offsets = [0, 0], sizes = [1, 128], strides = [1, 1]} : vector<4x128xf32> to vector<1x128xf32>
    %cst_123 = arith.constant 1.000000e+00 : f32
    %395 = vector.broadcast %cst_123 : f32 to vector<1x128xf32>
    %cst_124 = arith.constant 0.000000e+00 : f32
    %396 = vector.broadcast %cst_124 : f32 to vector<1x128xf32>
    %397 = arith.cmpf olt, %394, %393 : vector<1x128xf32>
    %398 = arith.extui %397 : vector<1x128xi1> to vector<1x128xi32>
    %399 = arith.sitofp %398 : vector<1x128xi32> to vector<1x128xf32>
    %400 = arith.subf %395, %399 : vector<1x128xf32>
    %401 = arith.addf %396, %399 : vector<1x128xf32>
    %402 = vector.extract_strided_slice %390 {offsets = [1, 0], sizes = [1, 128], strides = [1, 1]} : vector<4x128xf32> to vector<1x128xf32>
    %403 = arith.addf %394, %402 : vector<1x128xf32>
    %404 = arith.cmpf olt, %403, %393 : vector<1x128xf32>
    %405 = arith.extui %404 : vector<1x128xi1> to vector<1x128xi32>
    %406 = arith.sitofp %405 : vector<1x128xi32> to vector<1x128xf32>
    %407 = arith.subf %399, %406 : vector<1x128xf32>
    %408 = arith.addf %401, %406 : vector<1x128xf32>
    %409 = vector.extract_strided_slice %390 {offsets = [2, 0], sizes = [1, 128], strides = [1, 1]} : vector<4x128xf32> to vector<1x128xf32>
    %410 = arith.addf %403, %409 : vector<1x128xf32>
    %411 = arith.cmpf olt, %410, %393 : vector<1x128xf32>
    %412 = arith.extui %411 : vector<1x128xi1> to vector<1x128xi32>
    %413 = arith.sitofp %412 : vector<1x128xi32> to vector<1x128xf32>
    %414 = arith.subf %406, %413 : vector<1x128xf32>
    %415 = arith.addf %408, %413 : vector<1x128xf32>
    %416 = tpu.concatenate %400, %407, %414, %413 in 0 : vector<1x128xf32>, vector<1x128xf32>, vector<1x128xf32>, vector<1x128xf32> -> vector<4x128xf32>
    %cst_125 = arith.constant 1.500000e-01 : f32
    %417 = vector.broadcast %cst_125 : f32 to vector<4x128xf32>
    %418 = arith.mulf %417, %416 : vector<4x128xf32>
    %cst_126 = arith.constant 1.500000e-01 : f32
    %419 = vector.broadcast %cst_126 : f32 to vector<4x128xf32>
    %420 = arith.addf %419, %418 : vector<4x128xf32>
    %421 = arith.mulf %420, %382 : vector<4x128xf32>
    %422 = arith.addf %351, %421 : vector<4x128xf32>
    %cst_127 = arith.constant 0.949999988 : f32
    %423 = vector.broadcast %cst_127 : f32 to vector<4x128xf32>
    %424 = arith.mulf %423, %422 : vector<4x128xf32>
    %cst_128 = arith.constant 2.000000e-01 : f32
    %425 = vector.broadcast %cst_128 : f32 to vector<1x128xf32>
    %426 = arith.mulf %425, %383 : vector<1x128xf32>
    %427 = arith.addf %356, %426 : vector<1x128xf32>
    %cst_129 = arith.constant 0.949999988 : f32
    %428 = vector.broadcast %cst_129 : f32 to vector<1x128xf32>
    %429 = arith.mulf %428, %427 : vector<1x128xf32>
    %430 = arith.index_cast %c5_i32 : i32 to index
    %c0_130 = arith.constant 0 : index
    %c0_131 = arith.constant 0 : index
    %431 = vector.load %arg6[%430, %c0_130, %c0_131] : memref<8x4x128xf32, #tpu.memory_space<vmem>>, vector<1x4x128xf32>
    %432 = vector.shape_cast %431 : vector<1x4x128xf32> to vector<4x128xf32>
    %433 = vector.shape_cast %382 : vector<4x128xf32> to vector<1x4x128xf32>
    tpu.vector_store %arg6[%430, %c0_130, %c0_131], %433 {strides = array<i32>} : memref<8x4x128xf32, #tpu.memory_space<vmem>>, vector<1x4x128xf32>,
    %434 = arith.index_cast %c5_i32 : i32 to index
    %c0_132 = arith.constant 0 : index
    %c0_133 = arith.constant 0 : index
    %435 = vector.load %arg7[%434, %c0_132, %c0_133] : memref<8x1x128xf32, #tpu.memory_space<vmem>>, vector<1x1x128xf32>
    %436 = vector.shape_cast %435 : vector<1x1x128xf32> to vector<1x128xf32>
    %437 = vector.shape_cast %383 : vector<1x128xf32> to vector<1x1x128xf32>
    tpu.vector_store %arg7[%434, %c0_132, %c0_133], %437 {strides = array<i32>} : memref<8x1x128xf32, #tpu.memory_space<vmem>>, vector<1x1x128xf32>,
    %438 = arith.fptosi %415 : vector<1x128xf32> to vector<1x128xi32>
    %439 = arith.index_cast %c5_i32 : i32 to index
    %c0_134 = arith.constant 0 : index
    %c0_135 = arith.constant 0 : index
    %440 = vector.load %arg8[%439, %c0_134, %c0_135] : memref<8x1x128xi32, #tpu.memory_space<vmem>>, vector<1x1x128xi32>
    %441 = vector.shape_cast %440 : vector<1x1x128xi32> to vector<1x128xi32>
    %442 = vector.shape_cast %438 : vector<1x128xi32> to vector<1x1x128xi32>
    tpu.vector_store %arg8[%439, %c0_134, %c0_135], %442 {strides = array<i32>} : memref<8x1x128xi32, #tpu.memory_space<vmem>>, vector<1x1x128xi32>,
    %c6_i32 = arith.constant 6 : i32
    %443 = arith.index_cast %c6_i32 : i32 to index
    %c0_136 = arith.constant 0 : index
    %c0_137 = arith.constant 0 : index
    %444 = vector.load %arg4[%443, %c0_136, %c0_137] : memref<8x4x128xf32, #tpu.memory_space<vmem>>, vector<1x4x128xf32>
    %445 = vector.shape_cast %444 : vector<1x4x128xf32> to vector<4x128xf32>
    %446 = arith.index_cast %c6_i32 : i32 to index
    %c0_138 = arith.constant 0 : index
    %c0_139 = arith.constant 0 : index
    %447 = vector.load %arg5[%446, %c0_138, %c0_139] : memref<8x1x128xf32, #tpu.memory_space<vmem>>, vector<1x1x128xf32>
    %448 = vector.shape_cast %447 : vector<1x1x128xf32> to vector<1x128xf32>
    %cst_140 = arith.constant dense<0.000000e+00> : vector<128xf32>
    %449 = vector.multi_reduction <add>, %445, %cst_140 [0] : vector<4x128xf32> to vector<128xf32>
    %450 = vector.shape_cast %449 : vector<128xf32> to vector<1x128xf32>
    %cst_141 = arith.constant 2.500000e-01 : f32
    %451 = vector.broadcast %cst_141 : f32 to vector<1x128xf32>
    %452 = arith.mulf %450, %451 : vector<1x128xf32>
    %453 = vector.broadcast %429 : vector<1x128xf32> to vector<4x128xf32>
    %454 = arith.subf %445, %453 : vector<4x128xf32>
    %455 = arith.subf %454, %424 : vector<4x128xf32>
    %456 = arith.subf %452, %429 : vector<1x128xf32>
    %cst_142 = arith.constant dense<0xFF800000> : vector<128xf32>
    %457 = vector.multi_reduction <maximumf>, %424, %cst_142 [0] : vector<4x128xf32> to vector<128xf32>
    %458 = vector.shape_cast %457 : vector<128xf32> to vector<1x128xf32>
    %459 = vector.broadcast %458 : vector<1x128xf32> to vector<4x128xf32>
    %460 = arith.subf %424, %459 : vector<4x128xf32>
    %cst_143 = arith.constant 2.000000e+00 : f32
    %461 = vector.broadcast %cst_143 : f32 to vector<4x128xf32>
    %462 = arith.mulf %460, %461 : vector<4x128xf32>
    %463 = math.exp %462 : vector<4x128xf32>
    %cst_144 = arith.constant dense<0.000000e+00> : vector<128xf32>
    %464 = vector.multi_reduction <add>, %463, %cst_144 [0] : vector<4x128xf32> to vector<128xf32>
    %465 = vector.shape_cast %464 : vector<128xf32> to vector<1x128xf32>
    %466 = arith.mulf %448, %465 : vector<1x128xf32>
    %467 = vector.extract_strided_slice %463 {offsets = [0, 0], sizes = [1, 128], strides = [1, 1]} : vector<4x128xf32> to vector<1x128xf32>
    %cst_145 = arith.constant 1.000000e+00 : f32
    %468 = vector.broadcast %cst_145 : f32 to vector<1x128xf32>
    %cst_146 = arith.constant 0.000000e+00 : f32
    %469 = vector.broadcast %cst_146 : f32 to vector<1x128xf32>
    %470 = arith.cmpf olt, %467, %466 : vector<1x128xf32>
    %471 = arith.extui %470 : vector<1x128xi1> to vector<1x128xi32>
    %472 = arith.sitofp %471 : vector<1x128xi32> to vector<1x128xf32>
    %473 = arith.subf %468, %472 : vector<1x128xf32>
    %474 = arith.addf %469, %472 : vector<1x128xf32>
    %475 = vector.extract_strided_slice %463 {offsets = [1, 0], sizes = [1, 128], strides = [1, 1]} : vector<4x128xf32> to vector<1x128xf32>
    %476 = arith.addf %467, %475 : vector<1x128xf32>
    %477 = arith.cmpf olt, %476, %466 : vector<1x128xf32>
    %478 = arith.extui %477 : vector<1x128xi1> to vector<1x128xi32>
    %479 = arith.sitofp %478 : vector<1x128xi32> to vector<1x128xf32>
    %480 = arith.subf %472, %479 : vector<1x128xf32>
    %481 = arith.addf %474, %479 : vector<1x128xf32>
    %482 = vector.extract_strided_slice %463 {offsets = [2, 0], sizes = [1, 128], strides = [1, 1]} : vector<4x128xf32> to vector<1x128xf32>
    %483 = arith.addf %476, %482 : vector<1x128xf32>
    %484 = arith.cmpf olt, %483, %466 : vector<1x128xf32>
    %485 = arith.extui %484 : vector<1x128xi1> to vector<1x128xi32>
    %486 = arith.sitofp %485 : vector<1x128xi32> to vector<1x128xf32>
    %487 = arith.subf %479, %486 : vector<1x128xf32>
    %488 = arith.addf %481, %486 : vector<1x128xf32>
    %489 = tpu.concatenate %473, %480, %487, %486 in 0 : vector<1x128xf32>, vector<1x128xf32>, vector<1x128xf32>, vector<1x128xf32> -> vector<4x128xf32>
    %cst_147 = arith.constant 1.500000e-01 : f32
    %490 = vector.broadcast %cst_147 : f32 to vector<4x128xf32>
    %491 = arith.mulf %490, %489 : vector<4x128xf32>
    %cst_148 = arith.constant 1.500000e-01 : f32
    %492 = vector.broadcast %cst_148 : f32 to vector<4x128xf32>
    %493 = arith.addf %492, %491 : vector<4x128xf32>
    %494 = arith.mulf %493, %455 : vector<4x128xf32>
    %495 = arith.addf %424, %494 : vector<4x128xf32>
    %cst_149 = arith.constant 0.949999988 : f32
    %496 = vector.broadcast %cst_149 : f32 to vector<4x128xf32>
    %497 = arith.mulf %496, %495 : vector<4x128xf32>
    %cst_150 = arith.constant 2.000000e-01 : f32
    %498 = vector.broadcast %cst_150 : f32 to vector<1x128xf32>
    %499 = arith.mulf %498, %456 : vector<1x128xf32>
    %500 = arith.addf %429, %499 : vector<1x128xf32>
    %cst_151 = arith.constant 0.949999988 : f32
    %501 = vector.broadcast %cst_151 : f32 to vector<1x128xf32>
    %502 = arith.mulf %501, %500 : vector<1x128xf32>
    %503 = arith.index_cast %c6_i32 : i32 to index
    %c0_152 = arith.constant 0 : index
    %c0_153 = arith.constant 0 : index
    %504 = vector.load %arg6[%503, %c0_152, %c0_153] : memref<8x4x128xf32, #tpu.memory_space<vmem>>, vector<1x4x128xf32>
    %505 = vector.shape_cast %504 : vector<1x4x128xf32> to vector<4x128xf32>
    %506 = vector.shape_cast %455 : vector<4x128xf32> to vector<1x4x128xf32>
    tpu.vector_store %arg6[%503, %c0_152, %c0_153], %506 {strides = array<i32>} : memref<8x4x128xf32, #tpu.memory_space<vmem>>, vector<1x4x128xf32>,
    %507 = arith.index_cast %c6_i32 : i32 to index
    %c0_154 = arith.constant 0 : index
    %c0_155 = arith.constant 0 : index
    %508 = vector.load %arg7[%507, %c0_154, %c0_155] : memref<8x1x128xf32, #tpu.memory_space<vmem>>, vector<1x1x128xf32>
    %509 = vector.shape_cast %508 : vector<1x1x128xf32> to vector<1x128xf32>
    %510 = vector.shape_cast %456 : vector<1x128xf32> to vector<1x1x128xf32>
    tpu.vector_store %arg7[%507, %c0_154, %c0_155], %510 {strides = array<i32>} : memref<8x1x128xf32, #tpu.memory_space<vmem>>, vector<1x1x128xf32>,
    %511 = arith.fptosi %488 : vector<1x128xf32> to vector<1x128xi32>
    %512 = arith.index_cast %c6_i32 : i32 to index
    %c0_156 = arith.constant 0 : index
    %c0_157 = arith.constant 0 : index
    %513 = vector.load %arg8[%512, %c0_156, %c0_157] : memref<8x1x128xi32, #tpu.memory_space<vmem>>, vector<1x1x128xi32>
    %514 = vector.shape_cast %513 : vector<1x1x128xi32> to vector<1x128xi32>
    %515 = vector.shape_cast %511 : vector<1x128xi32> to vector<1x1x128xi32>
    tpu.vector_store %arg8[%512, %c0_156, %c0_157], %515 {strides = array<i32>} : memref<8x1x128xi32, #tpu.memory_space<vmem>>, vector<1x1x128xi32>,
    %c7_i32 = arith.constant 7 : i32
    %516 = arith.index_cast %c7_i32 : i32 to index
    %c0_158 = arith.constant 0 : index
    %c0_159 = arith.constant 0 : index
    %517 = vector.load %arg4[%516, %c0_158, %c0_159] : memref<8x4x128xf32, #tpu.memory_space<vmem>>, vector<1x4x128xf32>
    %518 = vector.shape_cast %517 : vector<1x4x128xf32> to vector<4x128xf32>
    %519 = arith.index_cast %c7_i32 : i32 to index
    %c0_160 = arith.constant 0 : index
    %c0_161 = arith.constant 0 : index
    %520 = vector.load %arg5[%519, %c0_160, %c0_161] : memref<8x1x128xf32, #tpu.memory_space<vmem>>, vector<1x1x128xf32>
    %521 = vector.shape_cast %520 : vector<1x1x128xf32> to vector<1x128xf32>
    %cst_162 = arith.constant dense<0.000000e+00> : vector<128xf32>
    %522 = vector.multi_reduction <add>, %518, %cst_162 [0] : vector<4x128xf32> to vector<128xf32>
    %523 = vector.shape_cast %522 : vector<128xf32> to vector<1x128xf32>
    %cst_163 = arith.constant 2.500000e-01 : f32
    %524 = vector.broadcast %cst_163 : f32 to vector<1x128xf32>
    %525 = arith.mulf %523, %524 : vector<1x128xf32>
    %526 = vector.broadcast %502 : vector<1x128xf32> to vector<4x128xf32>
    %527 = arith.subf %518, %526 : vector<4x128xf32>
    %528 = arith.subf %527, %497 : vector<4x128xf32>
    %529 = arith.subf %525, %502 : vector<1x128xf32>
    %cst_164 = arith.constant dense<0xFF800000> : vector<128xf32>
    %530 = vector.multi_reduction <maximumf>, %497, %cst_164 [0] : vector<4x128xf32> to vector<128xf32>
    %531 = vector.shape_cast %530 : vector<128xf32> to vector<1x128xf32>
    %532 = vector.broadcast %531 : vector<1x128xf32> to vector<4x128xf32>
    %533 = arith.subf %497, %532 : vector<4x128xf32>
    %cst_165 = arith.constant 2.000000e+00 : f32
    %534 = vector.broadcast %cst_165 : f32 to vector<4x128xf32>
    %535 = arith.mulf %533, %534 : vector<4x128xf32>
    %536 = math.exp %535 : vector<4x128xf32>
    %cst_166 = arith.constant dense<0.000000e+00> : vector<128xf32>
    %537 = vector.multi_reduction <add>, %536, %cst_166 [0] : vector<4x128xf32> to vector<128xf32>
    %538 = vector.shape_cast %537 : vector<128xf32> to vector<1x128xf32>
    %539 = arith.mulf %521, %538 : vector<1x128xf32>
    %540 = vector.extract_strided_slice %536 {offsets = [0, 0], sizes = [1, 128], strides = [1, 1]} : vector<4x128xf32> to vector<1x128xf32>
    %cst_167 = arith.constant 1.000000e+00 : f32
    %541 = vector.broadcast %cst_167 : f32 to vector<1x128xf32>
    %cst_168 = arith.constant 0.000000e+00 : f32
    %542 = vector.broadcast %cst_168 : f32 to vector<1x128xf32>
    %543 = arith.cmpf olt, %540, %539 : vector<1x128xf32>
    %544 = arith.extui %543 : vector<1x128xi1> to vector<1x128xi32>
    %545 = arith.sitofp %544 : vector<1x128xi32> to vector<1x128xf32>
    %546 = arith.subf %541, %545 : vector<1x128xf32>
    %547 = arith.addf %542, %545 : vector<1x128xf32>
    %548 = vector.extract_strided_slice %536 {offsets = [1, 0], sizes = [1, 128], strides = [1, 1]} : vector<4x128xf32> to vector<1x128xf32>
    %549 = arith.addf %540, %548 : vector<1x128xf32>
    %550 = arith.cmpf olt, %549, %539 : vector<1x128xf32>
    %551 = arith.extui %550 : vector<1x128xi1> to vector<1x128xi32>
    %552 = arith.sitofp %551 : vector<1x128xi32> to vector<1x128xf32>
    %553 = arith.subf %545, %552 : vector<1x128xf32>
    %554 = arith.addf %547, %552 : vector<1x128xf32>
    %555 = vector.extract_strided_slice %536 {offsets = [2, 0], sizes = [1, 128], strides = [1, 1]} : vector<4x128xf32> to vector<1x128xf32>
    %556 = arith.addf %549, %555 : vector<1x128xf32>
    %557 = arith.cmpf olt, %556, %539 : vector<1x128xf32>
    %558 = arith.extui %557 : vector<1x128xi1> to vector<1x128xi32>
    %559 = arith.sitofp %558 : vector<1x128xi32> to vector<1x128xf32>
    %560 = arith.subf %552, %559 : vector<1x128xf32>
    %561 = arith.addf %554, %559 : vector<1x128xf32>
    %562 = tpu.concatenate %546, %553, %560, %559 in 0 : vector<1x128xf32>, vector<1x128xf32>, vector<1x128xf32>, vector<1x128xf32> -> vector<4x128xf32>
    %cst_169 = arith.constant 1.500000e-01 : f32
    %563 = vector.broadcast %cst_169 : f32 to vector<4x128xf32>
    %564 = arith.mulf %563, %562 : vector<4x128xf32>
    %cst_170 = arith.constant 1.500000e-01 : f32
    %565 = vector.broadcast %cst_170 : f32 to vector<4x128xf32>
    %566 = arith.addf %565, %564 : vector<4x128xf32>
    %567 = arith.mulf %566, %528 : vector<4x128xf32>
    %568 = arith.addf %497, %567 : vector<4x128xf32>
    %cst_171 = arith.constant 0.949999988 : f32
    %569 = vector.broadcast %cst_171 : f32 to vector<4x128xf32>
    %570 = arith.mulf %569, %568 : vector<4x128xf32>
    %cst_172 = arith.constant 2.000000e-01 : f32
    %571 = vector.broadcast %cst_172 : f32 to vector<1x128xf32>
    %572 = arith.mulf %571, %529 : vector<1x128xf32>
    %573 = arith.addf %502, %572 : vector<1x128xf32>
    %cst_173 = arith.constant 0.949999988 : f32
    %574 = vector.broadcast %cst_173 : f32 to vector<1x128xf32>
    %575 = arith.mulf %574, %573 : vector<1x128xf32>
    %576 = arith.index_cast %c7_i32 : i32 to index
    %c0_174 = arith.constant 0 : index
    %c0_175 = arith.constant 0 : index
    %577 = vector.load %arg6[%576, %c0_174, %c0_175] : memref<8x4x128xf32, #tpu.memory_space<vmem>>, vector<1x4x128xf32>
    %578 = vector.shape_cast %577 : vector<1x4x128xf32> to vector<4x128xf32>
    %579 = vector.shape_cast %528 : vector<4x128xf32> to vector<1x4x128xf32>
    tpu.vector_store %arg6[%576, %c0_174, %c0_175], %579 {strides = array<i32>} : memref<8x4x128xf32, #tpu.memory_space<vmem>>, vector<1x4x128xf32>,
    %580 = arith.index_cast %c7_i32 : i32 to index
    %c0_176 = arith.constant 0 : index
    %c0_177 = arith.constant 0 : index
    %581 = vector.load %arg7[%580, %c0_176, %c0_177] : memref<8x1x128xf32, #tpu.memory_space<vmem>>, vector<1x1x128xf32>
    %582 = vector.shape_cast %581 : vector<1x1x128xf32> to vector<1x128xf32>
    %583 = vector.shape_cast %529 : vector<1x128xf32> to vector<1x1x128xf32>
    tpu.vector_store %arg7[%580, %c0_176, %c0_177], %583 {strides = array<i32>} : memref<8x1x128xf32, #tpu.memory_space<vmem>>, vector<1x1x128xf32>,
    %584 = arith.fptosi %561 : vector<1x128xf32> to vector<1x128xi32>
    %585 = arith.index_cast %c7_i32 : i32 to index
    %c0_178 = arith.constant 0 : index
    %c0_179 = arith.constant 0 : index
    %586 = vector.load %arg8[%585, %c0_178, %c0_179] : memref<8x1x128xi32, #tpu.memory_space<vmem>>, vector<1x1x128xi32>
    %587 = vector.shape_cast %586 : vector<1x1x128xi32> to vector<1x128xi32>
    %588 = vector.shape_cast %584 : vector<1x128xi32> to vector<1x1x128xi32>
    tpu.vector_store %arg8[%585, %c0_178, %c0_179], %588 {strides = array<i32>} : memref<8x1x128xi32, #tpu.memory_space<vmem>>, vector<1x1x128xi32>,
    %c8_i32 = arith.constant 8 : i32
    %c0_180 = arith.constant 0 : index
    %c0_181 = arith.constant 0 : index
    %589 = vector.load %arg9[%c0_180, %c0_181] : memref<4x128xf32, #tpu.memory_space<vmem>>, vector<4x128xf32>
    tpu.vector_store %arg9[%c0_180, %c0_181], %570 {strides = array<i32>} : memref<4x128xf32, #tpu.memory_space<vmem>>, vector<4x128xf32>,
    %c0_182 = arith.constant 0 : index
    %c0_183 = arith.constant 0 : index
    %590 = vector.load %arg10[%c0_182, %c0_183] : memref<1x128xf32, #tpu.memory_space<vmem>>, vector<1x128xf32>
    tpu.vector_store %arg10[%c0_182, %c0_183], %575 {strides = array<i32>} : memref<1x128xf32, #tpu.memory_space<vmem>>, vector<1x128xf32>,
    return
  }
  func.func @transform_0(%arg0: i32, %arg1: i32) -> (i32, i32) {
    %c0_i32 = arith.constant 0 : i32
    %c0_i32_0 = arith.constant 0 : i32
    return %c0_i32, %arg0 : i32, i32
  }
  func.func @transform_1(%arg0: i32, %arg1: i32) -> (i32, i32) {
    %c0_i32 = arith.constant 0 : i32
    %c0_i32_0 = arith.constant 0 : i32
    return %c0_i32, %arg0 : i32, i32
  }
  func.func @transform_2(%arg0: i32, %arg1: i32) -> (i32, i32, i32) {
    %c0_i32 = arith.constant 0 : i32
    %c0_i32_0 = arith.constant 0 : i32
    return %arg1, %c0_i32, %arg0 : i32, i32, i32
  }
  func.func @transform_3(%arg0: i32, %arg1: i32) -> (i32, i32, i32) {
    %c0_i32 = arith.constant 0 : i32
    %c0_i32_0 = arith.constant 0 : i32
    return %arg1, %c0_i32, %arg0 : i32, i32, i32
  }
  func.func @transform_4(%arg0: i32, %arg1: i32) -> (i32, i32, i32) {
    %c0_i32 = arith.constant 0 : i32
    %c0_i32_0 = arith.constant 0 : i32
    return %arg1, %c0_i32, %arg0 : i32, i32, i32
  }
  func.func @transform_5(%arg0: i32, %arg1: i32) -> (i32, i32, i32) {
    %c0_i32 = arith.constant 0 : i32
    %c0_i32_0 = arith.constant 0 : i32
    return %arg1, %c0_i32, %arg0 : i32, i32, i32
  }
  func.func @transform_6(%arg0: i32, %arg1: i32) -> (i32, i32, i32) {
    %c0_i32 = arith.constant 0 : i32
    %c0_i32_0 = arith.constant 0 : i32
    return %arg1, %c0_i32, %arg0 : i32, i32, i32
  }
  func.func @transform_7(%arg0: i32, %arg1: i32) -> (i32, i32) {
    %c0_i32 = arith.constant 0 : i32
    %c0_i32_0 = arith.constant 0 : i32
    return %c0_i32, %arg0 : i32, i32
  }
  func.func @transform_8(%arg0: i32, %arg1: i32) -> (i32, i32) {
    %c0_i32 = arith.constant 0 : i32
    %c0_i32_0 = arith.constant 0 : i32
    return %c0_i32, %arg0 : i32, i32
  }
}

</mosaic_0001>

<bundles_post_ra>
// kernel: relative_rollout.1
= control target key start
LH: loop header
LB: loop body
LE: loop exit
PB: predicated region body
PF: predicated region fallthrough
CT: control target
= control target key end

     0   :  { %14 = vsyncpa [#allocation3], 0  ;;  %s1439_s0 = inlined_call_operand.hbm [shape: f32[4,128], index: 0, kind: input, shape index: {}]   ;;  %s1440_s1 = inlined_call_operand.hbm [shape: f32[1,128], index: 1, kind: input, shape index: {}]   ;;  %s1441_s2 = inlined_call_operand.hbm [shape: f32[8,4,128], index: 2, kind: input, shape index: {}]   ;;  %s1442_s3 = inlined_call_operand.hbm [shape: f32[8,1,128], index: 3, kind: input, shape index: {}]   ;;  %s1443_s4 = inlined_call_operand.hbm [shape: f32[8,4,128], index: 4, kind: output, shape index: {0}]   ;;  %s1444_s5 = inlined_call_operand.hbm [shape: f32[8,1,128], index: 5, kind: output, shape index: {1}]   ;;  %s1445_s6 = inlined_call_operand.hbm [shape: s32[8,1,128], index: 6, kind: output, shape index: {2}]   ;;  %s1446_s7 = inlined_call_operand.hbm [shape: f32[4,128], index: 7, kind: output, shape index: {3}]   ;;  %s1447_s8 = inlined_call_operand.hbm [shape: f32[1,128], index: 8, kind: output, shape index: {4}]  }
   0x1   :  { %15 = vsyncpa [#allocation6], 0 }
   0x2   :  { %16 = vsyncpa [#allocation9], 0 }
   0x3   :  { %17 = vsyncpa [#allocation4], 0 }
   0x4   :  { %18 = vsyncpa [#allocation12], 0  ;;  %s36_s29 = sshll.u32 %s1440_s1, 4  ;;  %s37_s29 = int_to_ptr.hbm [resolvable:$true] %s36_s29 }
   0x5   :  { %19 = vsyncpa [#allocation15], 0  ;;  %s1193_s30 = smov [#allocation5]   ;;  %s25_s12 = sshll.u32 %s1439_s0, 4  ;;  %s26_s12 = int_to_ptr.hbm [resolvable:$true] %s25_s12 }
   0x6   :  { %s38_s9 = sshll.u32 %s1193_s30, 4  ;;  %s1194_s13 = smov [#allocation2]   ;;  %s39_s9 = int_to_ptr.vmem [resolvable:$true] %s38_s9 }
   0x7   :  { %41 = dma.hbm_to_vmem [thread:$0]  %s37_s29, 16, %s39_s9, [#allocation6]  }
   0x8   :  { %s27_s14 = sshll.u32 %s1194_s13, 4  ;;  %s46_s17 = sshll.u32 %s1441_s2, 4  ;;  %s28_s14 = int_to_ptr.vmem [resolvable:$true] %s27_s14  ;;  %s47_s17 = int_to_ptr.hbm [resolvable:$true] %s46_s17 }
   0x9   :  { %30 = dma.hbm_to_vmem [thread:$0]  %s26_s12, 64, %s28_s14, [#allocation3]  }
   0xa   :  { %s1195_s1 = smov [#allocation7]   ;;  %s59_s21 = sshll.u32 %s1442_s3, 4  ;;  %s60_s21 = int_to_ptr.hbm [resolvable:$true] %s59_s21 }
   0xb   :  { %s48_s18 = sshll.u32 %s1195_s1, 4  ;;  %s1196_s22 = smov 64   ;;  %s49_s18 = int_to_ptr.vmem [resolvable:$true] %s48_s18 }
   0xc   :  { %s1197_s0 = smov 4   ;;  %s1198_s23 = smov [#allocation8]  }
   0xd   :  { %54 = dma.hbm_to_vmem [thread:$0]  %s47_s17, 512, %s49_s18, [#allocation6], %s1196_s22, %s1196_s22, %s1197_s0  }
   0xe   :  { %s61_s24 = sshll.u32 %s1198_s23, 4  ;;  %s1199_s2 = smov 16   ;;  %s62_s24 = int_to_ptr.vmem [resolvable:$true] %s61_s24 }
   0xf   :  { %s1200_s25 = smov 1  }
  0x10   :  { %67 = dma.hbm_to_vmem [thread:$0]  %s60_s21, 128, %s62_s24, [#allocation9], %s1199_s2, %s1199_s2, %s1200_s25  }
  0x11   :  { %1181 = dma.done.wait [#allocation3], 64  }
  0x12   :  { %1182 = vsyncadd [#allocation3], 4294967232 }
  0x13   :  { %1183 = dma.done.wait [#allocation6], 528  }
  0x14   :  { %1184 = vsyncadd [#allocation6], 4294966768 }
  0x15   :  { %1185 = dma.done.wait [#allocation9], 128  }
  0x16   :  { %1186 = vsyncadd [#allocation9], 4294967168  ;;  %vm96_vm0 = vcmask 1043456   ;;  %v88_v0 = vld [vmem:[#allocation2] sm:$0xf]  ;;  %vm161_vm4 = vcmask 1040384  }
  0x17   :  { %v90_v1 = vld [vmem:[#allocation5] sm:$0x1]  ;;  %v94_v2 = vld [vmem:[#allocation7] sm:$0xf]  ;;  %89 = vst [vmem:[#allocation14] sm:$0xf] %v88_v0 }
  0x18   :  { %v97_v3 = vsel %vm96_vm0, %v94_v2, 0.0  ;;  %91 = vst [vmem:[#allocation16] sm:$0x1] %v90_v1  ;;  %v1271_v5 = vld [vmem:[#allocation7 + $0x4] sm:$0xf]  ;;  %vm163_vm5 = vcmask 1041408  }
  0x19   :  { %v98_v4 = vrot.slane %v97_v3, 4  ;;  %v183_v6 = vsel %vm96_vm0, %v1271_v5, 0.0  ;;  %v1275_v7 = vld [vmem:[#allocation7 + $0x8] sm:$0xf]  ;;  %v1279_v12 = vld [vmem:[#allocation7 + $0xc] sm:$0xf] }
  0x1a   :  { %v184_v9 = vrot.slane %v183_v6, 4  ;;  %v269_v10 = vsel %vm96_vm0, %v1275_v7, 0.0  ;;  %v355_v19 = vsel %vm96_vm0, %v1279_v12, 0.0  ;;  %v1290_v33 = vld [vmem:[#allocation7 + $0x10] sm:$0xf]  ;;  %vm165_vm6 = vcmask 1042432  }
  0x1b   :  { %v99_v8 = vadd.f32 %v98_v4, %v97_v3  ;;  %v270_v11 = vrot.slane %v269_v10, 4  ;;  %v356_v27 = vrot.slane %v355_v19, 4  ;;  %v441_v41 = vsel %vm96_vm0, %v1290_v33, 0.0  ;;  %v1298_v52 = vld [vmem:[#allocation7 + $0x14] sm:$0xf]  ;;  %s1202_s3 = smov [#allocation11]  }
  0x1c   :  { %v185_v14 = vadd.f32 %v184_v9, %v183_v6  ;;  %v442_v45 = vrot.slane %v441_v41, 4  ;;  %v527_v58 = vsel %vm96_vm0, %v1298_v52, 0.0  ;;  %s800_s26 = sshll.u32 %s1202_s3, 4  ;;  %s802_s29 = sshll.u32 %s1444_s5, 4  ;;  %s801_s26 = int_to_ptr.vmem [resolvable:$true] %s800_s26  ;;  %s803_s29 = int_to_ptr.hbm [resolvable:$true] %s802_s29 }
  0x1d   :  { %v100_v13 = vrot.slane %v99_v8, 2  ;;  %v271_v15 = vadd.f32 %v270_v11, %v269_v10  ;;  %v357_v37 = vadd.f32 %v356_v27, %v355_v19  ;;  %v528_v1 = vrot.slane %v527_v58, 4  ;;  %s1203_s5 = smov [#allocation10]   ;;  %s789_s11 = sshll.u32 %s1443_s4, 4  ;;  %s790_s11 = int_to_ptr.hbm [resolvable:$true] %s789_s11 }
  0x1e   :  { %v1281_v16 = vld [vmem:[#allocation14] sm:$0xf]  ;;  %v186_v18 = vrot.slane %v185_v14, 2  ;;  %v443_v53 = vadd.f32 %v442_v45, %v441_v41  ;;  %s787_s30 = sshll.u32 %s1203_s5, 4  ;;  %s1204_s4 = smov [#allocation13]   ;;  %s788_s30 = int_to_ptr.vmem [resolvable:$true] %s787_s30 }
  0x1f   :  { %v101_v17 = vadd.f32 %v100_v13, %v99_v8  ;;  %v948_v20 = vld [vmem:[#allocation16] ss:$0 sm:$0xff]  ;;  %v111_v21 = vsel %vm96_vm0, %v1281_v16, -inf  ;;  %v272_v26 = vrot.slane %v271_v15, 2  ;;  %v358_v44 = vrot.slane %v357_v37, 2  ;;  %s813_s12 = sshll.u32 %s1204_s4, 4  ;;  %s814_s12 = int_to_ptr.vmem [resolvable:$true] %s813_s12 }
  0x20   :  { %v112_v22 = vrot.slane %v111_v21, 4  ;;  %v187_v24 = vadd.f32 %v186_v18, %v185_v14  ;;  %v108_v25 = vsub.f32 %v94_v2, %v948_v20  ;;  %v93_v31 = vld [vmem:[#allocation16] sm:$0x1]  ;;  %v444_v61 = vrot.slane %v443_v53, 2  ;;  %v1304_v2 = vld [vmem:[#allocation7 + $0x18] sm:$0xf] }
  0x21   :  { %v102_v23 = vrot.slane %v101_v17, 1  ;;  %v273_v36 = vadd.f32 %v272_v26, %v271_v15  ;;  %v359_v57 = vadd.f32 %v358_v44, %v357_v37  ;;  %v613_v9 = vsel %vm96_vm0, %v1304_v2, 0.0  ;;  %v95_v44 = vld [vmem:[#allocation8] sm:$0x1]  ;;  %s815_s15 = sshll.u32 %s1445_s6, 4  ;;  %s1205_s16 = smov [#allocation14]   ;;  %s816_s15 = int_to_ptr.hbm [resolvable:$true] %s815_s15 }
  0x22   :  { %v113_v28 = vmax.f32 %v111_v21, %v112_v22  ;;  %v188_v30 = vrot.slane %v187_v24, 1  ;;  %v1288_v32 = vsub.f32 %v108_v25, %v1281_v16  ;;  %v445_v4 = vadd.f32 %v444_v61, %v443_v53  ;;  %s827_s17 = sshll.u32 %s1205_s16, 4  ;;  %s829_s6 = sshll.u32 %s1446_s7, 4  ;;  %s828_s17 = int_to_ptr.vmem [resolvable:$true] %s827_s17  ;;  %s830_s6 = int_to_ptr.hbm [resolvable:$true] %s829_s6 }
  0x23   :  { %v103_v29 = vadd.f32 %v102_v23, %v101_v17  ;;  %v274_v49 = vrot.slane %v273_v36, 1  ;;  %v360_v0 = vrot.slane %v359_v57, 1  ;;  %v529_v10 = vadd.f32 %v528_v1, %v527_v58  ;;  %s1206_s19 = smov [#allocation16]  }
  0x24   :  { %v114_v34 = vrot.slane %v113_v28, 2  ;;  %175 = vst [vmem:[#allocation10] sm:$0xf] %v1288_v32  ;;  %v189_v40 = vadd.f32 %v188_v30, %v187_v24  ;;  %v446_v15 = vrot.slane %v445_v4, 1  ;;  %v614_v17 = vrot.slane %v613_v9, 4  ;;  %s838_s20 = sshll.u32 %s1206_s19, 4  ;;  %s839_s20 = int_to_ptr.vmem [resolvable:$true] %s838_s20 }
  0x25   :  { %v104_v35 = vmul.f32 0.25, %v103_v29  ;;  %v275_v56 = vadd.f32 %v274_v49, %v273_v36  ;;  %v361_v8 = vadd.f32 %v360_v0, %v359_v57  ;;  %v530_v22 = vrot.slane %v529_v10, 2 }
  0x26   :  { %v115_v38 = vmax.f32 %v113_v28, %v114_v34  ;;  %v190_v48 = vmul.f32 0.25, %v189_v40  ;;  %v447_v26 = vadd.f32 %v446_v15, %v445_v4  ;;  %v615_v27 = vadd.f32 %v614_v17, %v613_v9  ;;  %v1312_v28 = vld [vmem:[#allocation7 + $0x1c] sm:$0xf] }
  0x27   :  { %v110_v39 = vsub.f32 %v104_v35, %v93_v31  ;;  %v276_v63 = vmul.f32 0.25, %v275_v56  ;;  %v362_v20 = vmul.f32 0.25, %v361_v8  ;;  %v531_v35 = vadd.f32 %v530_v22, %v529_v10 }
  0x28   :  { %v116_v42 = vrot.slane %v115_v38, 1 }
  0x29   :  { %v172_v43 = vmul.f32 0.2, %v110_v39  ;;  %176 = vst [vmem:[#allocation11] sm:$0x1] %v110_v39  ;;  %v532_v45 = vrot.slane %v531_v35, 1 }
  0x2a   :  { %v117_v46 = vmax.f32 %v115_v38, %v116_v42  ;;  %v699_v38 = vsel %vm96_vm0, %v1312_v28, 0.0 }
  0x2b   :  { %v173_v47 = vadd.f32 %v172_v43, %v93_v31  ;;  %v448_v43 = vmul.f32 0.25, %v447_v26  ;;  %v533_v57 = vadd.f32 %v532_v45, %v531_v35 }
  0x2c   :  { %v118_v50 = vsub.f32 %v1281_v16, %v117_v46  ;;  %v700_v46 = vrot.slane %v699_v38, 4 }
  0x2d   :  { %v1296_v51 = vmul.f32 0.95, %v173_v47  ;;  %v534_v8 = vmul.f32 0.25, %v533_v57 }
  0x2e   :  { %v119_v54 = vmul.f32 2.0, %v118_v50  ;;  %v701_v58 = vadd.f32 %v700_v46, %v699_v38 }
  0x2f   :  { %v196_v55 = vsub.f32 %v190_v48, %v1296_v51 }
  0x30   :  { %v120_v59 = vmul.f32 1.442695, %v119_v54 }
  0x31   :  { %v255_v60 = vmul.f32 0.2, %v196_v55  ;;  %261 = vst [vmem:[#allocation11 + $0x1] sm:$0x1] %v196_v55 }
  0x32   :  { %949 = vpow2.f32 %v120_v59  ;;  %v1201_v59 = vmov 0.0  }
  0x33   :  { %v256_v62 = vadd.f32 %v255_v60, %v1296_v51 }
  0x35   :  { %v257_v3 = vmul.f32 0.95, %v256_v62 }
  0x37   :  { %v282_v6 = vsub.f32 %v276_v63, %v257_v3  ;;  %v278_v21 = vperm.slane %v257_v3, 0 }
  0x38   :  { %v950_v11 = vpop.eup %949 }
  0x39   :  { %v341_v13 = vmul.f32 0.2, %v282_v6  ;;  %347 = vst [vmem:[#allocation11 + $0x2] sm:$0x1] %v282_v6  ;;  %v122_v14 = vsel %vm96_vm0, %v950_v11, 0.0  ;;  %v1310_v25 = vsub.f32 %v1275_v7, %v278_v21  ;;  %v136_v30 = vrot.slane %v950_v11, 1 }
  0x3a   :  { %v123_v18 = vrot.slane %v122_v14, 4  ;;  %v616_v7 = vrot.slane %v615_v27, 2  ;;  %v144_v48 = vrot.slane %v950_v11, 2 }
  0x3b   :  { %v342_v19 = vadd.f32 %v341_v13, %v257_v3  ;;  %v138_v41 = vadd.f32 %v950_v11, %v136_v30  ;;  %v702_v13 = vrot.slane %v701_v58, 2 }
  0x3c   :  { %v124_v23 = vadd.f32 %v123_v18, %v122_v14  ;;  %v617_v50 = vadd.f32 %v616_v7, %v615_v27 }
  0x3d   :  { %v343_v24 = vmul.f32 0.95, %v342_v19  ;;  %v146_v54 = vadd.f32 %v144_v48, %v138_v41 }
  0x3e   :  { %v125_v29 = vrot.slane %v124_v23, 2  ;;  %v618_v3 = vrot.slane %v617_v50, 1 }
  0x3f   :  { %v368_v31 = vsub.f32 %v362_v20, %v343_v24  ;;  %v364_v34 = vperm.slane %v343_v24, 0 }
  0x40   :  { %v126_v36 = vadd.f32 %v125_v29, %v124_v23 }
  0x41   :  { %v427_v37 = vmul.f32 0.2, %v368_v31  ;;  %433 = vst [vmem:[#allocation11 + $0x3] sm:$0x1] %v368_v31  ;;  %v1317_v39 = vsub.f32 %v1279_v12, %v364_v34 }
  0x42   :  { %v127_v40 = vrot.slane %v126_v36, 1 }
  0x43   :  { %v428_v42 = vadd.f32 %v427_v37, %v343_v24  ;;  %v703_v24 = vadd.f32 %v702_v13, %v701_v58 }
  0x44   :  { %v128_v47 = vadd.f32 %v127_v40, %v126_v36  ;;  %v192_v40 = vperm.slane %v1296_v51, 0 }
  0x45   :  { %v429_v49 = vmul.f32 0.95, %v428_v42  ;;  %v704_v38 = vrot.slane %v703_v24, 1 }
  0x46   :  { %v129_v53 = vmul.f32 %v128_v47, %v95_v44 }
  0x47   :  { %v454_v55 = vsub.f32 %v448_v43, %v429_v49  ;;  %v450_v56 = vperm.slane %v429_v49, 0  ;;  %v705_v44 = vadd.f32 %v704_v38, %v703_v24 }
  0x48   :  { %vm130_vm1 = vcmp.lt.f32.partialorder %v950_v11, %v129_v53  ;;  %vm139_vm2 = vcmp.lt.f32.partialorder %v138_v41, %v129_v53  ;;  %vm147_vm3 = vcmp.lt.f32.partialorder %v146_v54, %v129_v53 }
  0x49   :  { %v513_v12 = vmul.f32 0.2, %v454_v55  ;;  %519 = vst [vmem:[#allocation11 + $0x4] sm:$0x1] %v454_v55  ;;  %v870_v60 = vsel %vm130_vm1, 1.0, %v1201_v59  ;;  %v871_v61 = vsel %vm139_vm2, 1.0, %v1201_v59  ;;  %v1323_v63 = vsub.f32 %v1290_v33, %v450_v56 }
  0x4a   :  { %v872_v62 = vsel %vm147_vm3, 1.0, %v1201_v59  ;;  %v142_v0 = vsub.f32 %v870_v60, %v871_v61  ;;  %v143_v4 = vadd.f32 %v871_v61, %v870_v60  ;;  %v133_v9 = vsub.f32 1.0, %v870_v60 }
  0x4b   :  { %v150_v1 = vsub.f32 %v871_v61, %v872_v62  ;;  %v514_v6 = vadd.f32 %v513_v12, %v429_v49  ;;  %v159_v17 = vrot.slane %v872_v62, 5  ;;  %v619_v33 = vadd.f32 %v618_v3, %v617_v50 }
  0x4c   :  { %v153_v10 = vrot.slane %v142_v0, 7  ;;  %v151_v14 = vadd.f32 %v872_v62, %v143_v4 }
  0x4d   :  { %v156_v11 = vrot.slane %v150_v1, 6  ;;  %v515_v15 = vmul.f32 0.95, %v514_v6  ;;  %v620_v37 = vmul.f32 0.25, %v619_v33 }
  0x4e   :  { %v162_v18 = vsel %vm161_vm4, %v133_v9, %v153_v10  ;;  %vm894_vm7 = vcmp.lt.s32.totalorder %v151_v14, 0  ;;  %v895_v20 = vceil.f32 %v151_v14  ;;  %v896_v21 = vfloor.f32 %v151_v14 }
  0x4f   :  { %v164_v19 = vsel %vm163_vm5, %v162_v18, %v156_v11  ;;  %v540_v23 = vsub.f32 %v534_v8, %v515_v15  ;;  %v536_v26 = vperm.slane %v515_v15, 0 }
  0x50   :  { %v166_v22 = vsel %vm165_vm6, %v164_v19, %v159_v17  ;;  %v897_v29 = vsel %vm894_vm7, %v895_v20, %v896_v21 }
  0x51   :  { %v167_v27 = vmul.f32 0.15, %v166_v22  ;;  %v898_v30 = vcvt.f32.s32 %v897_v29  ;;  %v599_v31 = vmul.f32 0.2, %v540_v23  ;;  %605 = vst [vmem:[#allocation11 + $0x5] sm:$0x1] %v540_v23  ;;  %v1329_v34 = vsub.f32 %v1298_v52, %v536_v26 }
  0x52   :  { %v194_v52 = vsub.f32 %v1271_v5, %v192_v40 }
  0x53   :  { %v168_v35 = vadd.f32 0.15, %v167_v27  ;;  %178 = vst [vmem:[#allocation13] sm:$0x1] %v898_v30  ;;  %v600_v36 = vadd.f32 %v599_v31, %v515_v15  ;;  %v182_v15 = vld [vmem:[#allocation8 + $0x1] sm:$0x1] }
  0x55   :  { %v169_v7 = vmul.f32 %v168_v35, %v1288_v32  ;;  %v601_v41 = vmul.f32 0.95, %v600_v36 }
  0x57   :  { %v170_v42 = vadd.f32 %v169_v7, %v1281_v16  ;;  %v626_v43 = vsub.f32 %v620_v37, %v601_v41  ;;  %v622_v45 = vperm.slane %v601_v41, 0  ;;  %v706_v16 = vmul.f32 0.25, %v705_v44 }
  0x59   :  { %v1334_v46 = vmul.f32 0.95, %v170_v42  ;;  %v685_v47 = vmul.f32 0.2, %v626_v43  ;;  %691 = vst [vmem:[#allocation11 + $0x6] sm:$0x1] %v626_v43  ;;  %v1338_v48 = vsub.f32 %v1304_v2, %v622_v45 }
  0x5b   :  { %v197_v32 = vsel %vm96_vm0, %v1334_v46, -inf  ;;  %v195_v51 = vsub.f32 %v194_v52, %v1334_v46  ;;  %v686_v50 = vadd.f32 %v685_v47, %v601_v41 }
  0x5c   :  { %v198_v49 = vrot.slane %v197_v32, 4 }
  0x5d   :  { %259 = vst [vmem:[#allocation10 + $0x4] sm:$0xf] %v195_v51  ;;  %v687_v54 = vmul.f32 0.95, %v686_v50 }
  0x5e   :  { %v199_v53 = vmax.f32 %v197_v32, %v198_v49 }
  0x5f   :  { %v712_v56 = vsub.f32 %v706_v16, %v687_v54  ;;  %v708_v57 = vperm.slane %v687_v54, 0 }
  0x60   :  { %v200_v55 = vrot.slane %v199_v53, 2 }
  0x61   :  { %v771_v58 = vmul.f32 0.2, %v712_v56  ;;  %777 = vst [vmem:[#allocation11 + $0x7] sm:$0x1] %v712_v56  ;;  %v1344_v2 = vsub.f32 %v1312_v28, %v708_v57 }
  0x62   :  { %v201_v5 = vmax.f32 %v199_v53, %v200_v55  ;;  %808 = dma.vmem_to_hbm [thread:$0]  %s801_s26, 128, %s803_s29, [#allocation12], %s1199_s2, %s1199_s2, %s1200_s25  }
  0x63   :  { %v772_v60 = vadd.f32 %v771_v58, %v687_v54 }
  0x64   :  { %v202_v12 = vrot.slane %v201_v5, 1 }
  0x65   :  { %v773_v62 = vmul.f32 0.95, %v772_v60 }
  0x66   :  { %v203_v61 = vmax.f32 %v201_v5, %v202_v12 }
  0x67   :  { %782 = vst [vmem:[#allocation16] sm:$0x1] %v773_v62 }
  0x68   :  { %v204_v0 = vsub.f32 %v1334_v46, %v203_v61 }
  0x6a   :  { %v205_v1 = vmul.f32 2.0, %v204_v0 }
  0x6c   :  { %v206_v3 = vmul.f32 1.442695, %v205_v1 }
  0x6e   :  { %951 = vpow2.f32 %v206_v3  ;;  %v268_v3 = vld [vmem:[#allocation8 + $0x2] sm:$0x1] }
  0x74   :  { %v952_v4 = vpop.eup %951 }
  0x75   :  { %v208_v6 = vsel %vm96_vm0, %v952_v4, 0.0  ;;  %v222_v11 = vrot.slane %v952_v4, 1  ;;  %v230_v18 = vrot.slane %v952_v4, 2 }
  0x76   :  { %v209_v8 = vrot.slane %v208_v6, 4 }
  0x77   :  { %v224_v14 = vadd.f32 %v952_v4, %v222_v11 }
  0x78   :  { %v210_v9 = vadd.f32 %v209_v8, %v208_v6 }
  0x79   :  { %v232_v19 = vadd.f32 %v230_v18, %v224_v14 }
  0x7a   :  { %v211_v10 = vrot.slane %v210_v9, 2 }
  0x7c   :  { %v212_v13 = vadd.f32 %v211_v10, %v210_v9 }
  0x7e   :  { %v213_v28 = vrot.slane %v212_v13, 1 }
  0x80   :  { %v214_v17 = vadd.f32 %v213_v28, %v212_v13 }
  0x82   :  { %v215_v33 = vmul.f32 %v214_v17, %v182_v15 }
  0x84   :  { %vm216_vm8 = vcmp.lt.f32.partialorder %v952_v4, %v215_v33  ;;  %vm225_vm9 = vcmp.lt.f32.partialorder %v224_v14, %v215_v33  ;;  %vm233_vm10 = vcmp.lt.f32.partialorder %v232_v19, %v215_v33 }
  0x85   :  { %v873_v20 = vsel %vm216_vm8, 1.0, %v1201_v59  ;;  %v874_v21 = vsel %vm225_vm9, 1.0, %v1201_v59  ;;  %v875_v22 = vsel %vm233_vm10, 1.0, %v1201_v59 }
  0x86   :  { %v228_v23 = vsub.f32 %v873_v20, %v874_v21  ;;  %v236_v24 = vsub.f32 %v874_v21, %v875_v22  ;;  %v229_v26 = vadd.f32 %v874_v21, %v873_v20  ;;  %v219_v27 = vsub.f32 1.0, %v873_v20 }
  0x87   :  { %v245_v35 = vrot.slane %v875_v22, 5 }
  0x88   :  { %v239_v29 = vrot.slane %v228_v23, 7  ;;  %v242_v30 = vrot.slane %v236_v24, 6  ;;  %v237_v31 = vadd.f32 %v875_v22, %v229_v26 }
  0x8a   :  { %v247_v36 = vsel %vm161_vm4, %v219_v27, %v239_v29  ;;  %vm899_vm11 = vcmp.lt.s32.totalorder %v237_v31, 0  ;;  %v900_v38 = vceil.f32 %v237_v31  ;;  %v901_v7 = vfloor.f32 %v237_v31 }
  0x8b   :  { %v248_v37 = vsel %vm163_vm5, %v247_v36, %v242_v30 }
  0x8c   :  { %v249_v40 = vsel %vm165_vm6, %v248_v37, %v245_v35  ;;  %v902_v42 = vsel %vm899_vm11, %v900_v38, %v901_v7 }
  0x8d   :  { %v250_v41 = vmul.f32 0.15, %v249_v40  ;;  %v903_v43 = vcvt.f32.s32 %v902_v42 }
  0x8f   :  { %v251_v44 = vadd.f32 0.15, %v250_v41  ;;  %264 = vst [vmem:[#allocation13 + $0x1] sm:$0x1] %v903_v43 }
  0x91   :  { %v252_v45 = vmul.f32 %v251_v44, %v195_v51 }
  0x93   :  { %v253_v52 = vadd.f32 %v252_v45, %v1334_v46 }
  0x95   :  { %v254_v47 = vmul.f32 0.95, %v253_v52 }
  0x97   :  { %v283_v32 = vsel %vm96_vm0, %v254_v47, -inf  ;;  %v281_v49 = vsub.f32 %v1310_v25, %v254_v47 }
  0x98   :  { %v284_v50 = vrot.slane %v283_v32, 4 }
  0x99   :  { %345 = vst [vmem:[#allocation10 + $0x8] sm:$0xf] %v281_v49 }
  0x9a   :  { %v285_v16 = vmax.f32 %v283_v32, %v284_v50 }
  0x9c   :  { %v286_v53 = vrot.slane %v285_v16, 2 }
  0x9e   :  { %v287_v54 = vmax.f32 %v285_v16, %v286_v53 }
  0xa0   :  { %v288_v55 = vrot.slane %v287_v54, 1 }
  0xa2   :  { %v289_v56 = vmax.f32 %v287_v54, %v288_v55 }
  0xa4   :  { %v290_v57 = vsub.f32 %v254_v47, %v289_v56 }
  0xa6   :  { %v291_v5 = vmul.f32 2.0, %v290_v57 }
  0xa8   :  { %v292_v58 = vmul.f32 1.442695, %v291_v5  ;;  %v354_v5 = vld [vmem:[#allocation8 + $0x3] sm:$0x1] }
  0xaa   :  { %953 = vpow2.f32 %v292_v58 }
  0xb0   :  { %v954_v12 = vpop.eup %953 }
  0xb1   :  { %v294_v51 = vsel %vm96_vm0, %v954_v12, 0.0  ;;  %v308_v62 = vrot.slane %v954_v12, 1  ;;  %v316_v6 = vrot.slane %v954_v12, 2 }
  0xb2   :  { %v295_v46 = vrot.slane %v294_v51, 4 }
  0xb3   :  { %v310_v1 = vadd.f32 %v954_v12, %v308_v62 }
  0xb4   :  { %v296_v60 = vadd.f32 %v295_v46, %v294_v51 }
  0xb5   :  { %v318_v9 = vadd.f32 %v316_v6, %v310_v1 }
  0xb6   :  { %v297_v61 = vrot.slane %v296_v60, 2 }
  0xb8   :  { %v298_v0 = vadd.f32 %v297_v61, %v296_v60 }
  0xba   :  { %v299_v25 = vrot.slane %v298_v0, 1 }
  0xbc   :  { %v300_v4 = vadd.f32 %v299_v25, %v298_v0 }
  0xbe   :  { %v301_v8 = vmul.f32 %v300_v4, %v268_v3 }
  0xc0   :  { %vm302_vm12 = vcmp.lt.f32.partialorder %v954_v12, %v301_v8  ;;  %vm311_vm13 = vcmp.lt.f32.partialorder %v310_v1, %v301_v8  ;;  %vm319_vm14 = vcmp.lt.f32.partialorder %v318_v9, %v301_v8 }
  0xc1   :  { %v876_v10 = vsel %vm302_vm12, 1.0, %v1201_v59  ;;  %v877_v11 = vsel %vm311_vm13, 1.0, %v1201_v59  ;;  %v878_v13 = vsel %vm319_vm14, 1.0, %v1201_v59 }
  0xc2   :  { %v314_v28 = vsub.f32 %v876_v10, %v877_v11  ;;  %v322_v14 = vsub.f32 %v877_v11, %v878_v13  ;;  %v315_v15 = vadd.f32 %v877_v11, %v876_v10  ;;  %v305_v17 = vsub.f32 1.0, %v876_v10 }
  0xc3   :  { %v331_v20 = vrot.slane %v878_v13, 5 }
  0xc4   :  { %v325_v18 = vrot.slane %v314_v28, 7  ;;  %v328_v33 = vrot.slane %v322_v14, 6  ;;  %v323_v19 = vadd.f32 %v878_v13, %v315_v15 }
  0xc6   :  { %v333_v21 = vsel %vm161_vm4, %v305_v17, %v325_v18  ;;  %vm904_vm15 = vcmp.lt.s32.totalorder %v323_v19, 0  ;;  %v905_v23 = vceil.f32 %v323_v19  ;;  %v906_v24 = vfloor.f32 %v323_v19 }
  0xc7   :  { %v334_v22 = vsel %vm163_vm5, %v333_v21, %v328_v33 }
  0xc8   :  { %v335_v26 = vsel %vm165_vm6, %v334_v22, %v331_v20  ;;  %v907_v29 = vsel %vm904_vm15, %v905_v23, %v906_v24 }
  0xc9   :  { %v336_v27 = vmul.f32 0.15, %v335_v26  ;;  %v908_v30 = vcvt.f32.s32 %v907_v29 }
  0xcb   :  { %v337_v31 = vadd.f32 0.15, %v336_v27  ;;  %350 = vst [vmem:[#allocation13 + $0x2] sm:$0x1] %v908_v30 }
  0xcd   :  { %v338_v35 = vmul.f32 %v337_v31, %v281_v49 }
  0xcf   :  { %v339_v36 = vadd.f32 %v338_v35, %v254_v47 }
  0xd1   :  { %v340_v37 = vmul.f32 0.95, %v339_v36 }
  0xd3   :  { %v369_v38 = vsel %vm96_vm0, %v340_v37, -inf  ;;  %v367_v7 = vsub.f32 %v1317_v39, %v340_v37 }
  0xd4   :  { %v370_v40 = vrot.slane %v369_v38, 4 }
  0xd5   :  { %431 = vst [vmem:[#allocation10 + $0xc] sm:$0xf] %v367_v7 }
  0xd6   :  { %v371_v41 = vmax.f32 %v369_v38, %v370_v40 }
  0xd8   :  { %v372_v42 = vrot.slane %v371_v41, 2 }
  0xda   :  { %v373_v43 = vmax.f32 %v371_v41, %v372_v42 }
  0xdc   :  { %v374_v44 = vrot.slane %v373_v43, 1 }
  0xde   :  { %v375_v45 = vmax.f32 %v373_v43, %v374_v44 }
  0xe0   :  { %v376_v52 = vsub.f32 %v340_v37, %v375_v45 }
  0xe2   :  { %v377_v32 = vmul.f32 2.0, %v376_v52  ;;  %v440_v52 = vld [vmem:[#allocation8 + $0x4] sm:$0x1] }
  0xe4   :  { %v378_v50 = vmul.f32 1.442695, %v377_v32 }
  0xe6   :  { %955 = vpow2.f32 %v378_v50 }
  0xec   :  { %v956_v16 = vpop.eup %955 }
  0xed   :  { %v380_v49 = vsel %vm96_vm0, %v956_v16, 0.0  ;;  %v394_v55 = vrot.slane %v956_v16, 1  ;;  %v402_v12 = vrot.slane %v956_v16, 2 }
  0xee   :  { %v381_v47 = vrot.slane %v380_v49, 4 }
  0xef   :  { %v396_v57 = vadd.f32 %v956_v16, %v394_v55 }
  0xf0   :  { %v382_v53 = vadd.f32 %v381_v47, %v380_v49 }
  0xf1   :  { %v404_v46 = vadd.f32 %v402_v12, %v396_v57 }
  0xf2   :  { %v383_v54 = vrot.slane %v382_v53, 2 }
  0xf4   :  { %v384_v56 = vadd.f32 %v383_v54, %v382_v53 }
  0xf6   :  { %v385_v39 = vrot.slane %v384_v56, 1 }
  0xf8   :  { %v386_v58 = vadd.f32 %v385_v39, %v384_v56 }
  0xfa   :  { %v387_v51 = vmul.f32 %v386_v58, %v354_v5 }
  0xfc   :  { %vm388_vm1 = vcmp.lt.f32.partialorder %v956_v16, %v387_v51  ;;  %vm397_vm2 = vcmp.lt.f32.partialorder %v396_v57, %v387_v51  ;;  %vm405_vm3 = vcmp.lt.f32.partialorder %v404_v46, %v387_v51 }
  0xfd   :  { %v879_v60 = vsel %vm388_vm1, 1.0, %v1201_v59  ;;  %v880_v61 = vsel %vm397_vm2, 1.0, %v1201_v59  ;;  %v881_v62 = vsel %vm405_vm3, 1.0, %v1201_v59 }
  0xfe   :  { %v400_v0 = vsub.f32 %v879_v60, %v880_v61  ;;  %v408_v25 = vsub.f32 %v880_v61, %v881_v62  ;;  %v401_v1 = vadd.f32 %v880_v61, %v879_v60  ;;  %v391_v3 = vsub.f32 1.0, %v879_v60 }
  0xff   :  { %v417_v9 = vrot.slane %v881_v62, 5 }
 0x100   :  { %v411_v4 = vrot.slane %v400_v0, 7  ;;  %v414_v6 = vrot.slane %v408_v25, 6  ;;  %v409_v8 = vadd.f32 %v881_v62, %v401_v1 }
 0x102   :  { %v419_v10 = vsel %vm161_vm4, %v391_v3, %v411_v4  ;;  %vm909_vm7 = vcmp.lt.s32.totalorder %v409_v8, 0  ;;  %v910_v13 = vceil.f32 %v409_v8  ;;  %v911_v28 = vfloor.f32 %v409_v8 }
 0x103   :  { %v420_v11 = vsel %vm163_vm5, %v419_v10, %v414_v6 }
 0x104   :  { %v421_v14 = vsel %vm165_vm6, %v420_v11, %v417_v9  ;;  %v912_v17 = vsel %vm909_vm7, %v910_v13, %v911_v28 }
 0x105   :  { %v422_v15 = vmul.f32 0.15, %v421_v14  ;;  %v913_v18 = vcvt.f32.s32 %v912_v17 }
 0x107   :  { %v423_v33 = vadd.f32 0.15, %v422_v15  ;;  %436 = vst [vmem:[#allocation13 + $0x3] sm:$0x1] %v913_v18 }
 0x109   :  { %v424_v19 = vmul.f32 %v423_v33, %v367_v7 }
 0x10b   :  { %v425_v20 = vadd.f32 %v424_v19, %v340_v37 }
 0x10d   :  { %v426_v21 = vmul.f32 0.95, %v425_v20 }
 0x10f   :  { %v455_v22 = vsel %vm96_vm0, %v426_v21, -inf  ;;  %v453_v23 = vsub.f32 %v1323_v63, %v426_v21 }
 0x110   :  { %v456_v24 = vrot.slane %v455_v22, 4 }
 0x111   :  { %517 = vst [vmem:[#allocation10 + $0x10] sm:$0xf] %v453_v23 }
 0x112   :  { %v457_v26 = vmax.f32 %v455_v22, %v456_v24 }
 0x114   :  { %v458_v27 = vrot.slane %v457_v26, 2 }
 0x116   :  { %v459_v29 = vmax.f32 %v457_v26, %v458_v27 }
 0x118   :  { %v460_v30 = vrot.slane %v459_v29, 1 }
 0x11a   :  { %v461_v31 = vmax.f32 %v459_v29, %v460_v30 }
 0x11c   :  { %v462_v35 = vsub.f32 %v426_v21, %v461_v31  ;;  %v526_v31 = vld [vmem:[#allocation8 + $0x5] sm:$0x1] }
 0x11e   :  { %v463_v36 = vmul.f32 2.0, %v462_v35 }
 0x120   :  { %v464_v38 = vmul.f32 1.442695, %v463_v36 }
 0x122   :  { %957 = vpow2.f32 %v464_v38 }
 0x128   :  { %v958_v40 = vpop.eup %957 }
 0x129   :  { %v466_v7 = vsel %vm96_vm0, %v958_v40, 0.0  ;;  %v480_v43 = vrot.slane %v958_v40, 1  ;;  %v488_v50 = vrot.slane %v958_v40, 2 }
 0x12a   :  { %v467_v37 = vrot.slane %v466_v7, 4 }
 0x12b   :  { %v482_v45 = vadd.f32 %v958_v40, %v480_v43 }
 0x12c   :  { %v468_v41 = vadd.f32 %v467_v37, %v466_v7 }
 0x12d   :  { %v490_v49 = vadd.f32 %v488_v50, %v482_v45 }
 0x12e   :  { %v469_v42 = vrot.slane %v468_v41, 2 }
 0x130   :  { %v470_v44 = vadd.f32 %v469_v42, %v468_v41 }
 0x132   :  { %v471_v63 = vrot.slane %v470_v44, 1 }
 0x134   :  { %v472_v32 = vadd.f32 %v471_v63, %v470_v44 }
 0x136   :  { %v473_v16 = vmul.f32 %v472_v32, %v440_v52 }
 0x138   :  { %vm474_vm8 = vcmp.lt.f32.partialorder %v958_v40, %v473_v16  ;;  %vm483_vm9 = vcmp.lt.f32.partialorder %v482_v45, %v473_v16  ;;  %vm491_vm10 = vcmp.lt.f32.partialorder %v490_v49, %v473_v16 }
 0x139   :  { %v882_v47 = vsel %vm474_vm8, 1.0, %v1201_v59  ;;  %v883_v53 = vsel %vm483_vm9, 1.0, %v1201_v59  ;;  %v884_v54 = vsel %vm491_vm10, 1.0, %v1201_v59 }
 0x13a   :  { %v486_v55 = vsub.f32 %v882_v47, %v883_v53  ;;  %v494_v56 = vsub.f32 %v883_v53, %v884_v54  ;;  %v487_v39 = vadd.f32 %v883_v53, %v882_v47  ;;  %v477_v57 = vsub.f32 1.0, %v882_v47 }
 0x13b   :  { %v503_v51 = vrot.slane %v884_v54, 5 }
 0x13c   :  { %v497_v5 = vrot.slane %v486_v55, 7  ;;  %v500_v58 = vrot.slane %v494_v56, 6  ;;  %v495_v12 = vadd.f32 %v884_v54, %v487_v39 }
 0x13e   :  { %v505_v46 = vsel %vm161_vm4, %v477_v57, %v497_v5  ;;  %vm914_vm11 = vcmp.lt.s32.totalorder %v495_v12, 0  ;;  %v915_v61 = vceil.f32 %v495_v12  ;;  %v916_v62 = vfloor.f32 %v495_v12 }
 0x13f   :  { %v506_v60 = vsel %vm163_vm5, %v505_v46, %v500_v58 }
 0x140   :  { %v507_v0 = vsel %vm165_vm6, %v506_v60, %v503_v51  ;;  %v917_v1 = vsel %vm914_vm11, %v915_v61, %v916_v62 }
 0x141   :  { %v508_v25 = vmul.f32 0.15, %v507_v0  ;;  %v918_v3 = vcvt.f32.s32 %v917_v1 }
 0x143   :  { %v509_v4 = vadd.f32 0.15, %v508_v25  ;;  %522 = vst [vmem:[#allocation13 + $0x4] sm:$0x1] %v918_v3 }
 0x145   :  { %v510_v6 = vmul.f32 %v509_v4, %v453_v23 }
 0x147   :  { %v511_v8 = vadd.f32 %v510_v6, %v426_v21 }
 0x149   :  { %v512_v9 = vmul.f32 0.95, %v511_v8 }
 0x14b   :  { %v541_v10 = vsel %vm96_vm0, %v512_v9, -inf  ;;  %v539_v11 = vsub.f32 %v1329_v34, %v512_v9 }
 0x14c   :  { %v542_v13 = vrot.slane %v541_v10, 4 }
 0x14d   :  { %603 = vst [vmem:[#allocation10 + $0x14] sm:$0xf] %v539_v11 }
 0x14e   :  { %v543_v28 = vmax.f32 %v541_v10, %v542_v13 }
 0x150   :  { %v544_v14 = vrot.slane %v543_v28, 2 }
 0x152   :  { %v545_v15 = vmax.f32 %v543_v28, %v544_v14 }
 0x154   :  { %v546_v17 = vrot.slane %v545_v15, 1 }
 0x156   :  { %v547_v18 = vmax.f32 %v545_v15, %v546_v17  ;;  %v612_v17 = vld [vmem:[#allocation8 + $0x6] sm:$0x1] }
 0x158   :  { %v548_v33 = vsub.f32 %v512_v9, %v547_v18 }
 0x15a   :  { %v549_v19 = vmul.f32 2.0, %v548_v33 }
 0x15c   :  { %v550_v20 = vmul.f32 1.442695, %v549_v19 }
 0x15e   :  { %959 = vpow2.f32 %v550_v20 }
 0x164   :  { %v960_v22 = vpop.eup %959 }
 0x165   :  { %v552_v23 = vsel %vm96_vm0, %v960_v22, 0.0  ;;  %v566_v27 = vrot.slane %v960_v22, 1  ;;  %v574_v36 = vrot.slane %v960_v22, 2 }
 0x166   :  { %v553_v21 = vrot.slane %v552_v23, 4 }
 0x167   :  { %v568_v30 = vadd.f32 %v960_v22, %v566_v27 }
 0x168   :  { %v554_v24 = vadd.f32 %v553_v21, %v552_v23 }
 0x169   :  { %v576_v40 = vadd.f32 %v574_v36, %v568_v30 }
 0x16a   :  { %v555_v26 = vrot.slane %v554_v24, 2 }
 0x16c   :  { %v556_v29 = vadd.f32 %v555_v26, %v554_v24 }
 0x16e   :  { %v557_v34 = vrot.slane %v556_v29, 1 }
 0x170   :  { %v558_v35 = vadd.f32 %v557_v34, %v556_v29 }
 0x172   :  { %v559_v38 = vmul.f32 %v558_v35, %v526_v31 }
 0x174   :  { %vm560_vm12 = vcmp.lt.f32.partialorder %v960_v22, %v559_v38  ;;  %vm569_vm13 = vcmp.lt.f32.partialorder %v568_v30, %v559_v38  ;;  %vm577_vm14 = vcmp.lt.f32.partialorder %v576_v40, %v559_v38 }
 0x175   :  { %v885_v7 = vsel %vm560_vm12, 1.0, %v1201_v59  ;;  %v886_v37 = vsel %vm569_vm13, 1.0, %v1201_v59  ;;  %v887_v41 = vsel %vm577_vm14, 1.0, %v1201_v59 }
 0x176   :  { %v572_v42 = vsub.f32 %v885_v7, %v886_v37  ;;  %v580_v43 = vsub.f32 %v886_v37, %v887_v41  ;;  %v573_v44 = vadd.f32 %v886_v37, %v885_v7  ;;  %v563_v63 = vsub.f32 1.0, %v885_v7 }
 0x177   :  { %v589_v50 = vrot.slane %v887_v41, 5 }
 0x178   :  { %v583_v45 = vrot.slane %v572_v42, 7  ;;  %v586_v52 = vrot.slane %v580_v43, 6  ;;  %v581_v32 = vadd.f32 %v887_v41, %v573_v44 }
 0x17a   :  { %v591_v16 = vsel %vm161_vm4, %v563_v63, %v583_v45  ;;  %vm919_vm15 = vcmp.lt.s32.totalorder %v581_v32, 0  ;;  %v920_v47 = vceil.f32 %v581_v32  ;;  %v921_v53 = vfloor.f32 %v581_v32 }
 0x17b   :  { %v592_v49 = vsel %vm163_vm5, %v591_v16, %v586_v52 }
 0x17c   :  { %v593_v54 = vsel %vm165_vm6, %v592_v49, %v589_v50  ;;  %v922_v56 = vsel %vm919_vm15, %v920_v47, %v921_v53 }
 0x17d   :  { %v594_v55 = vmul.f32 0.15, %v593_v54  ;;  %v923_v39 = vcvt.f32.s32 %v922_v56 }
 0x17f   :  { %v595_v57 = vadd.f32 0.15, %v594_v55  ;;  %608 = vst [vmem:[#allocation13 + $0x5] sm:$0x1] %v923_v39 }
 0x181   :  { %v596_v5 = vmul.f32 %v595_v57, %v539_v11 }
 0x183   :  { %v597_v58 = vadd.f32 %v596_v5, %v512_v9 }
 0x185   :  { %v598_v12 = vmul.f32 0.95, %v597_v58 }
 0x187   :  { %v627_v51 = vsel %vm96_vm0, %v598_v12, -inf  ;;  %v625_v46 = vsub.f32 %v1338_v48, %v598_v12 }
 0x188   :  { %v628_v60 = vrot.slane %v627_v51, 4 }
 0x189   :  { %689 = vst [vmem:[#allocation10 + $0x18] sm:$0xf] %v625_v46 }
 0x18a   :  { %v629_v61 = vmax.f32 %v627_v51, %v628_v60 }
 0x18c   :  { %v630_v62 = vrot.slane %v629_v61, 2 }
 0x18e   :  { %v631_v0 = vmax.f32 %v629_v61, %v630_v62 }
 0x190   :  { %v632_v25 = vrot.slane %v631_v0, 1 }
 0x192   :  { %v633_v1 = vmax.f32 %v631_v0, %v632_v25  ;;  %v698_v0 = vld [vmem:[#allocation8 + $0x7] sm:$0x1] }
 0x194   :  { %v634_v3 = vsub.f32 %v598_v12, %v633_v1 }
 0x196   :  { %v635_v4 = vmul.f32 2.0, %v634_v3 }
 0x198   :  { %v636_v6 = vmul.f32 1.442695, %v635_v4 }
 0x19a   :  { %961 = vpow2.f32 %v636_v6 }
 0x1a0   :  { %v962_v8 = vpop.eup %961 }
 0x1a1   :  { %v638_v10 = vsel %vm96_vm0, %v962_v8, 0.0  ;;  %v652_v28 = vrot.slane %v962_v8, 1  ;;  %v660_v33 = vrot.slane %v962_v8, 2 }
 0x1a2   :  { %v639_v9 = vrot.slane %v638_v10, 4 }
 0x1a3   :  { %v654_v15 = vadd.f32 %v962_v8, %v652_v28 }
 0x1a4   :  { %v640_v11 = vadd.f32 %v639_v9, %v638_v10 }
 0x1a5   :  { %v662_v20 = vadd.f32 %v660_v33, %v654_v15 }
 0x1a6   :  { %v641_v13 = vrot.slane %v640_v11, 2 }
 0x1a8   :  { %v642_v14 = vadd.f32 %v641_v13, %v640_v11 }
 0x1aa   :  { %v643_v48 = vrot.slane %v642_v14, 1 }
 0x1ac   :  { %v644_v18 = vadd.f32 %v643_v48, %v642_v14 }
 0x1ae   :  { %v645_v19 = vmul.f32 %v644_v18, %v612_v17 }
 0x1b0   :  { %vm646_vm1 = vcmp.lt.f32.partialorder %v962_v8, %v645_v19  ;;  %vm655_vm2 = vcmp.lt.f32.partialorder %v654_v15, %v645_v19  ;;  %vm663_vm3 = vcmp.lt.f32.partialorder %v662_v20, %v645_v19 }
 0x1b1   :  { %v888_v22 = vsel %vm646_vm1, 1.0, %v1201_v59  ;;  %v889_v23 = vsel %vm655_vm2, 1.0, %v1201_v59  ;;  %v890_v21 = vsel %vm663_vm3, 1.0, %v1201_v59 }
 0x1b2   :  { %v658_v24 = vsub.f32 %v888_v22, %v889_v23  ;;  %v666_v26 = vsub.f32 %v889_v23, %v890_v21  ;;  %v659_v27 = vadd.f32 %v889_v23, %v888_v22  ;;  %v649_v29 = vsub.f32 1.0, %v888_v22 }
 0x1b3   :  { %v675_v35 = vrot.slane %v890_v21, 5 }
 0x1b4   :  { %v669_v34 = vrot.slane %v658_v24, 7  ;;  %v672_v30 = vrot.slane %v666_v26, 6  ;;  %v667_v31 = vadd.f32 %v890_v21, %v659_v27 }
 0x1b6   :  { %v677_v36 = vsel %vm161_vm4, %v649_v29, %v669_v34  ;;  %vm924_vm7 = vcmp.lt.s32.totalorder %v667_v31, 0  ;;  %v925_v40 = vceil.f32 %v667_v31  ;;  %v926_v7 = vfloor.f32 %v667_v31 }
 0x1b7   :  { %v678_v38 = vsel %vm163_vm5, %v677_v36, %v672_v30 }
 0x1b8   :  { %v679_v37 = vsel %vm165_vm6, %v678_v38, %v675_v35  ;;  %v927_v42 = vsel %vm924_vm7, %v925_v40, %v926_v7 }
 0x1b9   :  { %v680_v41 = vmul.f32 0.15, %v679_v37  ;;  %v928_v43 = vcvt.f32.s32 %v927_v42 }
 0x1bb   :  { %v681_v44 = vadd.f32 0.15, %v680_v41  ;;  %694 = vst [vmem:[#allocation13 + $0x6] sm:$0x1] %v928_v43 }
 0x1bd   :  { %v682_v63 = vmul.f32 %v681_v44, %v625_v46 }
 0x1bf   :  { %v683_v45 = vadd.f32 %v682_v63, %v598_v12 }
 0x1c1   :  { %v1409_v52 = vmul.f32 0.95, %v683_v45 }
 0x1c3   :  { %v713_v32 = vsel %vm96_vm0, %v1409_v52, -inf  ;;  %v711_v50 = vsub.f32 %v1344_v2, %v1409_v52 }
 0x1c4   :  { %v714_v16 = vrot.slane %v713_v32, 4 }
 0x1c5   :  { %775 = vst [vmem:[#allocation10 + $0x1c] sm:$0xf] %v711_v50 }
 0x1c6   :  { %v715_v49 = vmax.f32 %v713_v32, %v714_v16  ;;  %795 = dma.vmem_to_hbm [thread:$0]  %s788_s30, 512, %s790_s11, [#allocation4], %s1196_s22, %s1196_s22, %s1197_s0  }
 0x1c7   :  { %s840_s0 = sshll.u32 %s1447_s8, 4  ;;  %s841_s0 = int_to_ptr.hbm [resolvable:$true] %s840_s0 }
 0x1c8   :  { %v716_v47 = vrot.slane %v715_v49, 2 }
 0x1ca   :  { %v717_v53 = vmax.f32 %v715_v49, %v716_v47 }
 0x1cc   :  { %v718_v54 = vrot.slane %v717_v53, 1 }
 0x1ce   :  { %v719_v55 = vmax.f32 %v717_v53, %v718_v54 }
 0x1d0   :  { %v720_v56 = vsub.f32 %v1409_v52, %v719_v55 }
 0x1d2   :  { %v721_v39 = vmul.f32 2.0, %v720_v56 }
 0x1d4   :  { %v722_v57 = vmul.f32 1.442695, %v721_v39 }
 0x1d6   :  { %963 = vpow2.f32 %v722_v57 }
 0x1dc   :  { %v964_v5 = vpop.eup %963 }
 0x1dd   :  { %v724_v2 = vsel %vm96_vm0, %v964_v5, 0.0  ;;  %v738_v46 = vrot.slane %v964_v5, 1  ;;  %v746_v1 = vrot.slane %v964_v5, 2 }
 0x1de   :  { %v725_v58 = vrot.slane %v724_v2, 4 }
 0x1df   :  { %v740_v62 = vadd.f32 %v964_v5, %v738_v46 }
 0x1e0   :  { %v726_v12 = vadd.f32 %v725_v58, %v724_v2 }
 0x1e1   :  { %v748_v4 = vadd.f32 %v746_v1, %v740_v62 }
 0x1e2   :  { %v727_v51 = vrot.slane %v726_v12, 2 }
 0x1e4   :  { %v728_v60 = vadd.f32 %v727_v51, %v726_v12 }
 0x1e6   :  { %v729_v61 = vrot.slane %v728_v60, 1 }
 0x1e8   :  { %v730_v25 = vadd.f32 %v729_v61, %v728_v60 }
 0x1ea   :  { %v731_v3 = vmul.f32 %v730_v25, %v698_v0 }
 0x1ec   :  { %vm732_vm8 = vcmp.lt.f32.partialorder %v964_v5, %v731_v3  ;;  %vm741_vm9 = vcmp.lt.f32.partialorder %v740_v62, %v731_v3  ;;  %vm749_vm10 = vcmp.lt.f32.partialorder %v748_v4, %v731_v3 }
 0x1ed   :  { %v891_v6 = vsel %vm732_vm8, 1.0, %v1201_v59  ;;  %v892_v8 = vsel %vm741_vm9, 1.0, %v1201_v59  ;;  %v893_v10 = vsel %vm749_vm10, 1.0, %v1201_v59 }
 0x1ee   :  { %v744_v9 = vsub.f32 %v891_v6, %v892_v8  ;;  %v752_v11 = vsub.f32 %v892_v8, %v893_v10  ;;  %v745_v13 = vadd.f32 %v892_v8, %v891_v6  ;;  %v735_v28 = vsub.f32 1.0, %v891_v6 }
 0x1ef   :  { %v761_v17 = vrot.slane %v893_v10, 5 }
 0x1f0   :  { %v755_v14 = vrot.slane %v744_v9, 7  ;;  %v758_v48 = vrot.slane %v752_v11, 6  ;;  %v753_v15 = vadd.f32 %v893_v10, %v745_v13 }
 0x1f2   :  { %v763_v18 = vsel %vm161_vm4, %v735_v28, %v755_v14  ;;  %vm929_vm0 = vcmp.lt.s32.totalorder %v753_v15, 0  ;;  %v930_v19 = vceil.f32 %v753_v15  ;;  %v931_v20 = vfloor.f32 %v753_v15 }
 0x1f3   :  { %v764_v33 = vsel %vm163_vm5, %v763_v18, %v758_v48 }
 0x1f4   :  { %v765_v59 = vsel %vm165_vm6, %v764_v33, %v761_v17  ;;  %v932_v23 = vsel %vm929_vm0, %v930_v19, %v931_v20 }
 0x1f5   :  { %v766_v22 = vmul.f32 0.15, %v765_v59  ;;  %v933_v21 = vcvt.f32.s32 %v932_v23 }
 0x1f7   :  { %v767_v24 = vadd.f32 0.15, %v766_v22  ;;  %780 = vst [vmem:[#allocation13 + $0x7] sm:$0x1] %v933_v21 }
 0x1f8   :  { %821 = dma.vmem_to_hbm [thread:$0]  %s814_s12, 128, %s816_s15, [#allocation12], %s1199_s2, %s1199_s2, %s1200_s25  }
 0x1f9   :  { %v768_v26 = vmul.f32 %v767_v24, %v711_v50 }
 0x1fb   :  { %v769_v27 = vadd.f32 %v768_v26, %v1409_v52 }
 0x1fd   :  { %v770_v29 = vmul.f32 0.95, %v769_v27 }
 0x1ff   :  { %781 = vst [vmem:[#allocation14] sm:$0xf] %v770_v29 }
 0x200   :  { %832 = dma.vmem_to_hbm [thread:$0]  %s828_s17, 64, %s830_s6, [#allocation15]  }
 0x201   :  { %843 = dma.vmem_to_hbm [thread:$0]  %s839_s20, 16, %s841_s0, [#allocation15]  }
 0x202   :  { %1187 = dma.done.wait [#allocation4], 512  }
 0x203   :  { %1188 = vsyncadd [#allocation4], 4294966784 }
 0x204   :  { %1189 = dma.done.wait [#allocation12], 256  }
 0x205   :  { %1190 = vsyncadd [#allocation12], 4294967040 }
 0x206   :  { %1191 = dma.done.wait [#allocation15], 80  }
 0x207   :  { %1192 = vsyncadd [#allocation15], 4294967216 }
 0x208   :  { %864 = vsyncpa [#allocation3], 1 }
 0x209   :  { %865 = vsyncpa [#allocation6], 1 }
 0x20a   :  { %866 = vsyncpa [#allocation9], 1 }
 0x20b   :  { %867 = vsyncpa [#allocation4], 1 }
 0x20c   :  { %868 = vsyncpa [#allocation12], 1 }
 0x20d   :  { %869 = vsyncpa [#allocation15], 1 }

</bundles_post_ra>
